<compile_context>
chip_gen: v5e
topology: v5e:2x2
jax: 0.10.0
libtpu: 0.0.40
codegen_flags: <defaults>
</compile_context>

<pallas_src>
import functools

import jax
import jax.numpy as jnp
from jax import lax
from jax.experimental import pallas as pl
from jax.experimental.pallas import tpu as pltpu

BN_EPS = 1e-5


def _round_up(x, m):
    return (x + m - 1) // m * m


# ---------------------------------------------------------------------------
# Fused kernel: conv1(3x3,s1,p1)+bn1+relu -> conv2(3x3,s2,p1)+bn2 + maxpool
# residual add + relu, for ONE image per grid step.
# ---------------------------------------------------------------------------
def _fused_basic_block_kernel(xe_ref, xo_ref, w1_ref, w2_ref, b1_ref, b2_ref,
                              m_ref, o_ref, oe_ref, oo_ref, *, rl, length):
    """All spatial data is flat (row-major, plane row stride `rl`).

    xe_ref / xo_ref : (Cin, LPAD)  bf16  even/odd padded-columns of x,
                      flattened, with 1 leading zero + zero tail.
    w1_ref          : (9, Cout, Cin)  bf16  conv1 weights (BN1 scale folded),
                      tap index = dy*3+dx.
    w2_ref          : (9, Cout, Cout) bf16  conv2 weights (BN2 scale folded).
    b1_ref / b2_ref : (Cout, 1) f32        BN shifts.
    m_ref           : (2, length) f32      {0,1} masks zeroing the out1
                      columns that must equal conv2's zero padding.
    o_ref           : (Cout, length) bf16  conv2 output, flat row stride 2*rl
                      (columns >= Wo of each row are don't-care).
    oe_ref / oo_ref : (Cout, LPAD) bf16    VMEM scratch, padded parity planes
                      of the conv1 activation (= conv2's input).
    """
    cout = w1_ref.shape[1]

    # Zero the scratch once per step (pad rows / pad columns / tail).
    oe_ref[...] = jnp.zeros_like(oe_ref)
    oo_ref[...] = jnp.zeros_like(oo_ref)

    # ---- conv1 (stride 1): 9 taps per output-column parity, all contiguous
    acc_e = jnp.zeros((cout, length), jnp.float32)
    acc_o = jnp.zeros((cout, length), jnp.float32)
    for dy in range(3):
        for dx in range(3):
            w = w1_ref[dy * 3 + dx]                      # (Cout, Cin) bf16
            # even out1p columns (odd out1 columns + left pad column)
            if dx == 0:
                src_e, off_e = xo_ref, dy * rl           # (-1 col) + prepend
            elif dx == 1:
                src_e, off_e = xe_ref, dy * rl + 1
            else:
                src_e, off_e = xo_ref, dy * rl + 1
            # odd out1p columns (even out1 columns + right pad column)
            if dx == 0:
                src_o, off_o = xe_ref, dy * rl + 1
            elif dx == 1:
                src_o, off_o = xo_ref, dy * rl + 1
            else:
                src_o, off_o = xe_ref, dy * rl + 2
            acc_e = acc_e + jnp.dot(src_e[:, off_e:off_e + length].T.T
                                    if False else
                                    w, src_e[:, off_e:off_e + length],
                                    preferred_element_type=jnp.float32)
            acc_o = acc_o + jnp.dot(w, src_o[:, off_o:off_o + length],
                                    preferred_element_type=jnp.float32)

    shift1 = b1_ref[...]                                  # (Cout, 1) f32
    y_e = jnp.maximum(acc_e + shift1, 0.0) * m_ref[0:1, :]
    y_o = jnp.maximum(acc_o + shift1, 0.0) * m_ref[1:2, :]

    # Drop rows 1..H of the padded conv1-activation planes into the scratch.
    oe_ref[:, rl:rl + length] = y_e.astype(jnp.bfloat16)
    oo_ref[:, rl:rl + length] = y_o.astype(jnp.bfloat16)

    # ---- conv2 (stride 2): 9 taps, all contiguous slices of the scratch ----
    acc2 = jnp.zeros((cout, length), jnp.float32)
    for dy in range(3):
        for dx in range(3):
            w = w2_ref[dy * 3 + dx]                      # (Cout, Cout) bf16
            if dx == 0:
                src, off = oe_ref, dy * rl
            elif dx == 1:
                src, off = oo_ref, dy * rl
            else:
                src, off = oe_ref, dy * rl + 1
            acc2 = acc2 + jnp.dot(w, src[:, off:off + length],
                                  preferred_element_type=jnp.float32)

    # ---- MaxPool2d(2,2) residual straight from the resident x planes -------
    res = jnp.maximum(
        jnp.maximum(xo_ref[:, rl + 1:rl + 1 + length],
                    xo_ref[:, 2 * rl + 1:2 * rl + 1 + length]),
        jnp.maximum(xe_ref[:, rl + 2:rl + 2 + length],
                    xe_ref[:, 2 * rl + 2:2 * rl + 2 + length]))

    y2 = acc2 + b2_ref[...] + res.astype(jnp.float32)
    o_ref[...] = jnp.maximum(y2, 0.0).astype(jnp.bfloat16)


# ---------------------------------------------------------------------------
# Wrapper: parameter folding, layout prep (one 1x XLA pass over x), pallas_call
# ---------------------------------------------------------------------------
def _fold_conv_bn(w_oihw, bn):
    """Fold eval-mode BN into the conv: returns (scaled weight f32, shift f32)."""
    scale = bn["gamma"] / jnp.sqrt(bn["var"] + BN_EPS)
    shift = bn["beta"] - bn["mean"] * scale
    return w_oihw * scale[:, None, None, None], shift


def basic_block_forward(x_nchw, params, stride=2):
    n, c, h, w = x_nchw.shape
    planes = params["w1"].shape[0]
    assert stride == 2, "only the default stride=2 BasicBlock is implemented"
    assert h % 2 == 0 and w % 2 == 0, "MaxPool2d(2,2) residual needs even H, W"
    assert c == planes, "residual add requires inplanes == planes"

    ho, wo = h // 2, w // 2
    rl = wo + 1                       # row stride of a column-parity plane
    length = h * rl                   # flat length of conv1/conv2/residual tiles
    lpad = _round_up((h + 2) * rl + 2, 128)   # plane length (prepend + tail)

    # 1x pass over x: bf16 cast, spatial pad, even/odd column split, flatten.
    xb = x_nchw.astype(jnp.bfloat16)
    xp = jnp.pad(xb, ((0, 0), (0, 0), (1, 1), (1, 1)))
    tail = lpad - 1 - (h + 2) * rl
    xe = jnp.pad(xp[:, :, :, 0::2].reshape(n, c, (h + 2) * rl),
                 ((0, 0), (0, 0), (1, tail)))
    xo = jnp.pad(xp[:, :, :, 1::2].reshape(n, c, (h + 2) * rl),
                 ((0, 0), (0, 0), (1, tail)))

    # Fold BN scale into the weights (f32), then bf16; keep shift separate.
    w1f, s1 = _fold_conv_bn(params["w1"], params["bn1"])
    w2f, s2 = _fold_conv_bn(params["w2"], params["bn2"])
    w1p = jnp.transpose(w1f, (2, 3, 0, 1)).reshape(9, planes, c).astype(jnp.bfloat16)
    w2p = jnp.transpose(w2f, (2, 3, 0, 1)).reshape(9, planes, planes).astype(jnp.bfloat16)
    b1 = s1[:, None].astype(jnp.float32)
    b2 = s2[:, None].astype(jnp.float32)

    # {0,1} masks zeroing the two out1 columns that act as conv2's zero pad.
    col = jnp.arange(length, dtype=jnp.int32) % rl
    masks = jnp.stack([(col != 0), (col != rl - 1)]).astype(jnp.float32)

    kernel = functools.partial(_fused_basic_block_kernel, rl=rl, length=length)
    out_flat = pl.pallas_call(
        kernel,
        out_shape=jax.ShapeDtypeStruct((n, planes, length), jnp.bfloat16),
        grid=(n,),
        in_specs=[
            pl.BlockSpec((None, c, lpad), lambda i: (i, 0, 0)),       # xe
            pl.BlockSpec((None, c, lpad), lambda i: (i, 0, 0)),       # xo
            pl.BlockSpec((9, planes, c), lambda i: (0, 0, 0)),        # w1
            pl.BlockSpec((9, planes, planes), lambda i: (0, 0, 0)),   # w2
            pl.BlockSpec((planes, 1), lambda i: (0, 0)),              # shift1
            pl.BlockSpec((planes, 1), lambda i: (0, 0)),              # shift2
            pl.BlockSpec((2, length), lambda i: (0, 0)),              # masks
        ],
        out_specs=pl.BlockSpec((None, planes, length), lambda i: (i, 0, 0)),
        scratch_shapes=[pltpu.VMEM((planes, lpad), jnp.bfloat16),
                        pltpu.VMEM((planes, lpad), jnp.bfloat16)],
        compiler_params=pltpu.CompilerParams(
            dimension_semantics=("parallel",)),
    )(xe, xo, w1p, w2p, b1, b2, masks)

    # Drop the don't-care columns (v >= Wo within each flat output row).
    out = out_flat.reshape(n, planes, ho, 2 * rl)[:, :, :, :wo]
    return out


# ---------------------------------------------------------------------------
# Pure-JAX reference mirroring the kernel's mixed precision
# ---------------------------------------------------------------------------
def reference_forward(x_nchw, params, stride=2):
    w1f, s1 = _fold_conv_bn(params["w1"], params["bn1"])
    w2f, s2 = _fold_conv_bn(params["w2"], params["bn2"])
    xb = x_nchw.astype(jnp.bfloat16)

    def conv(x, wgt, s):
        return lax.conv_general_dilated(
            x, wgt.astype(jnp.bfloat16), (s, s), [(1, 1), (1, 1)],
            dimension_numbers=("NCHW", "OIHW", "NCHW"),
            preferred_element_type=jnp.float32)

    y1 = jnp.maximum(conv(xb, w1f, 1) + s1[None, :, None, None], 0.0)
    y1 = y1.astype(jnp.bfloat16)
    y2 = conv(y1, w2f, stride) + s2[None, :, None, None]
    res = lax.reduce_window(xb.astype(jnp.float32), -jnp.inf, lax.max,
                            (1, 1, 2, 2), (1, 1, 2, 2), "VALID")
    return jnp.maximum(y2 + res, 0.0).astype(jnp.bfloat16)


# ---------------------------------------------------------------------------
# Deterministic parameter init
# ---------------------------------------------------------------------------
def init_params(key, inplanes, planes):
    ks = jax.random.split(key, 10)

    def bn(i):
        return dict(
            gamma=1.0 + 0.1 * jax.random.normal(ks[i], (planes,), jnp.float32),
            beta=0.1 * jax.random.normal(ks[i + 1], (planes,), jnp.float32),
            mean=0.1 * jax.random.normal(ks[i + 2], (planes,), jnp.float32),
            var=jnp.abs(jax.random.normal(ks[i + 3], (planes,), jnp.float32)) + 0.5,
        )

    return dict(
        w1=0.1 * jax.random.normal(ks[0], (planes, inplanes, 3, 3), jnp.float32),
        w2=0.1 * jax.random.normal(ks[1], (planes, planes, 3, 3), jnp.float32),
        bn1=bn(2),
        bn2=bn(6),
    )


if __name__ == "__main__":
    key = jax.random.PRNGKey(0)
    pkey, xkey = jax.random.split(key)

    inplanes = planes = 4          # residual add requires inplanes == planes
    N, H, W = 2, 16, 16
    params = init_params(pkey, inplanes, planes)
    x = jax.random.normal(xkey, (N, inplanes, H, W), jnp.float32)

    fwd = jax.jit(basic_block_forward, static_argnames=("stride",))
    out = jax.block_until_ready(fwd(x, params, stride=2))

    ref = reference_forward(x, params, stride=2)
    assert out.shape == ref.shape == (N, planes, H // 2, W // 2), out.shape
    # Both paths: folded bf16 weights, bf16 matmul inputs, f32 accumulation,
    # bf16 out1/out2 and bf16 residual -> remaining delta is accumulation
    # order plus rare 1-ulp bf16 rounding ties.
    err = float(jnp.max(jnp.abs(out.astype(jnp.float32) - ref.astype(jnp.float32))))
    assert err < 2.5e-2, err

    print("KERNEL_OK")
</pallas_src>

<mosaic_0001>
module attributes {stable_mosaic.version = 11 : i64} {
  func.func @_fused_basic_block_kernel(%arg0: i32, %arg1: memref<1x4x256xbf16, #tpu.memory_space<vmem>>, %arg2: memref<1x4x256xbf16, #tpu.memory_space<vmem>>, %arg3: memref<9x4x4xbf16, #tpu.memory_space<vmem>>, %arg4: memref<9x4x4xbf16, #tpu.memory_space<vmem>>, %arg5: memref<4x1xf32, #tpu.memory_space<vmem>>, %arg6: memref<4x1xf32, #tpu.memory_space<vmem>>, %arg7: memref<2x144xf32, #tpu.memory_space<vmem>>, %arg8: memref<1x4x144xbf16, #tpu.memory_space<vmem>>, %arg9: memref<4x256xbf16, #tpu.memory_space<vmem>>, %arg10: memref<4x256xbf16, #tpu.memory_space<vmem>>) attributes {dimension_semantics = [#tpu.dimension_semantics<parallel>], iteration_bounds = array<i64: 2>, scalar_prefetch = 0 : i64, scratch_operands = 2 : i64, tpu.core_type = #tpu.core_type<tc>, window_params = [{transform_indices = @transform_0, window_bounds = array<i64: 1, 4, 256>}, {transform_indices = @transform_1, window_bounds = array<i64: 1, 4, 256>}, {pipeline_mode = #tpu.pipeline_mode<synchronous>, transform_indices = @transform_2, window_bounds = array<i64: 9, 4, 4>}, {pipeline_mode = #tpu.pipeline_mode<synchronous>, transform_indices = @transform_3, window_bounds = array<i64: 9, 4, 4>}, {pipeline_mode = #tpu.pipeline_mode<synchronous>, transform_indices = @transform_4, window_bounds = array<i64: 4, 1>}, {pipeline_mode = #tpu.pipeline_mode<synchronous>, transform_indices = @transform_5, window_bounds = array<i64: 4, 1>}, {pipeline_mode = #tpu.pipeline_mode<synchronous>, transform_indices = @transform_6, window_bounds = array<i64: 2, 144>}, {transform_indices = @transform_7, window_bounds = array<i64: 1, 4, 144>}]} {
    %cst = arith.constant 0.000000e+00 : bf16
    %0 = vector.broadcast %cst : bf16 to vector<4x256xbf16>
    %c0 = arith.constant 0 : index
    %c0_0 = arith.constant 0 : index
    %1 = vector.load %arg9[%c0, %c0_0] : memref<4x256xbf16, #tpu.memory_space<vmem>>, vector<4x256xbf16>
    tpu.vector_store %arg9[%c0, %c0_0], %0 {strides = array<i32>} : memref<4x256xbf16, #tpu.memory_space<vmem>>, vector<4x256xbf16>,
    %cst_1 = arith.constant 0.000000e+00 : bf16
    %2 = vector.broadcast %cst_1 : bf16 to vector<4x256xbf16>
    %c0_2 = arith.constant 0 : index
    %c0_3 = arith.constant 0 : index
    %3 = vector.load %arg10[%c0_2, %c0_3] : memref<4x256xbf16, #tpu.memory_space<vmem>>, vector<4x256xbf16>
    tpu.vector_store %arg10[%c0_2, %c0_3], %2 {strides = array<i32>} : memref<4x256xbf16, #tpu.memory_space<vmem>>, vector<4x256xbf16>,
    %cst_4 = arith.constant 0.000000e+00 : f32
    %4 = vector.broadcast %cst_4 : f32 to vector<4x144xf32>
    %cst_5 = arith.constant 0.000000e+00 : f32
    %5 = vector.broadcast %cst_5 : f32 to vector<4x144xf32>
    %c0_6 = arith.constant 0 : index
    %c0_7 = arith.constant 0 : index
    %c0_8 = arith.constant 0 : index
    %6 = vector.load %arg3[%c0_6, %c0_7, %c0_8] : memref<9x4x4xbf16, #tpu.memory_space<vmem>>, vector<1x4x4xbf16>
    %7 = vector.shape_cast %6 : vector<1x4x4xbf16> to vector<4x4xbf16>
    %c0_9 = arith.constant 0 : index
    %c0_10 = arith.constant 0 : index
    %c0_11 = arith.constant 0 : index
    %8 = vector.load %arg2[%c0_9, %c0_10, %c0_11] : memref<1x4x256xbf16, #tpu.memory_space<vmem>>, vector<1x4x144xbf16>
    %9 = vector.shape_cast %8 : vector<1x4x144xbf16> to vector<4x144xbf16>
    %cst_12 = arith.constant dense<0.000000e+00> : vector<4x144xf32>
    %10 = tpu.matmul %7, %9, %cst_12 {dimension_numbers = #tpu.dot_dimension_numbers<[1], [0], [0], [1], [0, 0, 1, 1], [], []>} : vector<4x4xbf16>, vector<4x144xbf16>, vector<4x144xf32> -> vector<4x144xf32>
    %11 = arith.addf %4, %10 : vector<4x144xf32>
    %c0_13 = arith.constant 0 : index
    %c0_14 = arith.constant 0 : index
    %c1 = arith.constant 1 : index
    %12 = vector.load %arg1[%c0_13, %c0_14, %c1] : memref<1x4x256xbf16, #tpu.memory_space<vmem>>, vector<1x4x144xbf16>
    %13 = vector.shape_cast %12 : vector<1x4x144xbf16> to vector<4x144xbf16>
    %cst_15 = arith.constant dense<0.000000e+00> : vector<4x144xf32>
    %14 = tpu.matmul %7, %13, %cst_15 {dimension_numbers = #tpu.dot_dimension_numbers<[1], [0], [0], [1], [0, 0, 1, 1], [], []>} : vector<4x4xbf16>, vector<4x144xbf16>, vector<4x144xf32> -> vector<4x144xf32>
    %15 = arith.addf %5, %14 : vector<4x144xf32>
    %c1_16 = arith.constant 1 : index
    %c0_17 = arith.constant 0 : index
    %c0_18 = arith.constant 0 : index
    %16 = vector.load %arg3[%c1_16, %c0_17, %c0_18] : memref<9x4x4xbf16, #tpu.memory_space<vmem>>, vector<1x4x4xbf16>
    %17 = vector.shape_cast %16 : vector<1x4x4xbf16> to vector<4x4xbf16>
    %c0_19 = arith.constant 0 : index
    %c0_20 = arith.constant 0 : index
    %c1_21 = arith.constant 1 : index
    %18 = vector.load %arg1[%c0_19, %c0_20, %c1_21] : memref<1x4x256xbf16, #tpu.memory_space<vmem>>, vector<1x4x144xbf16>
    %19 = vector.shape_cast %18 : vector<1x4x144xbf16> to vector<4x144xbf16>
    %cst_22 = arith.constant dense<0.000000e+00> : vector<4x144xf32>
    %20 = tpu.matmul %17, %19, %cst_22 {dimension_numbers = #tpu.dot_dimension_numbers<[1], [0], [0], [1], [0, 0, 1, 1], [], []>} : vector<4x4xbf16>, vector<4x144xbf16>, vector<4x144xf32> -> vector<4x144xf32>
    %21 = arith.addf %11, %20 : vector<4x144xf32>
    %c0_23 = arith.constant 0 : index
    %c0_24 = arith.constant 0 : index
    %c1_25 = arith.constant 1 : index
    %22 = vector.load %arg2[%c0_23, %c0_24, %c1_25] : memref<1x4x256xbf16, #tpu.memory_space<vmem>>, vector<1x4x144xbf16>
    %23 = vector.shape_cast %22 : vector<1x4x144xbf16> to vector<4x144xbf16>
    %cst_26 = arith.constant dense<0.000000e+00> : vector<4x144xf32>
    %24 = tpu.matmul %17, %23, %cst_26 {dimension_numbers = #tpu.dot_dimension_numbers<[1], [0], [0], [1], [0, 0, 1, 1], [], []>} : vector<4x4xbf16>, vector<4x144xbf16>, vector<4x144xf32> -> vector<4x144xf32>
    %25 = arith.addf %15, %24 : vector<4x144xf32>
    %c2 = arith.constant 2 : index
    %c0_27 = arith.constant 0 : index
    %c0_28 = arith.constant 0 : index
    %26 = vector.load %arg3[%c2, %c0_27, %c0_28] : memref<9x4x4xbf16, #tpu.memory_space<vmem>>, vector<1x4x4xbf16>
    %27 = vector.shape_cast %26 : vector<1x4x4xbf16> to vector<4x4xbf16>
    %c0_29 = arith.constant 0 : index
    %c0_30 = arith.constant 0 : index
    %c1_31 = arith.constant 1 : index
    %28 = vector.load %arg2[%c0_29, %c0_30, %c1_31] : memref<1x4x256xbf16, #tpu.memory_space<vmem>>, vector<1x4x144xbf16>
    %29 = vector.shape_cast %28 : vector<1x4x144xbf16> to vector<4x144xbf16>
    %cst_32 = arith.constant dense<0.000000e+00> : vector<4x144xf32>
    %30 = tpu.matmul %27, %29, %cst_32 {dimension_numbers = #tpu.dot_dimension_numbers<[1], [0], [0], [1], [0, 0, 1, 1], [], []>} : vector<4x4xbf16>, vector<4x144xbf16>, vector<4x144xf32> -> vector<4x144xf32>
    %31 = arith.addf %21, %30 : vector<4x144xf32>
    %c0_33 = arith.constant 0 : index
    %c0_34 = arith.constant 0 : index
    %c2_35 = arith.constant 2 : index
    %32 = vector.load %arg1[%c0_33, %c0_34, %c2_35] : memref<1x4x256xbf16, #tpu.memory_space<vmem>>, vector<1x4x144xbf16>
    %33 = vector.shape_cast %32 : vector<1x4x144xbf16> to vector<4x144xbf16>
    %cst_36 = arith.constant dense<0.000000e+00> : vector<4x144xf32>
    %34 = tpu.matmul %27, %33, %cst_36 {dimension_numbers = #tpu.dot_dimension_numbers<[1], [0], [0], [1], [0, 0, 1, 1], [], []>} : vector<4x4xbf16>, vector<4x144xbf16>, vector<4x144xf32> -> vector<4x144xf32>
    %35 = arith.addf %25, %34 : vector<4x144xf32>
    %c3 = arith.constant 3 : index
    %c0_37 = arith.constant 0 : index
    %c0_38 = arith.constant 0 : index
    %36 = vector.load %arg3[%c3, %c0_37, %c0_38] : memref<9x4x4xbf16, #tpu.memory_space<vmem>>, vector<1x4x4xbf16>
    %37 = vector.shape_cast %36 : vector<1x4x4xbf16> to vector<4x4xbf16>
    %c0_39 = arith.constant 0 : index
    %c0_40 = arith.constant 0 : index
    %c9 = arith.constant 9 : index
    %38 = vector.load %arg2[%c0_39, %c0_40, %c9] : memref<1x4x256xbf16, #tpu.memory_space<vmem>>, vector<1x4x144xbf16>
    %39 = vector.shape_cast %38 : vector<1x4x144xbf16> to vector<4x144xbf16>
    %cst_41 = arith.constant dense<0.000000e+00> : vector<4x144xf32>
    %40 = tpu.matmul %37, %39, %cst_41 {dimension_numbers = #tpu.dot_dimension_numbers<[1], [0], [0], [1], [0, 0, 1, 1], [], []>} : vector<4x4xbf16>, vector<4x144xbf16>, vector<4x144xf32> -> vector<4x144xf32>
    %41 = arith.addf %31, %40 : vector<4x144xf32>
    %c0_42 = arith.constant 0 : index
    %c0_43 = arith.constant 0 : index
    %c10 = arith.constant 10 : index
    %42 = vector.load %arg1[%c0_42, %c0_43, %c10] : memref<1x4x256xbf16, #tpu.memory_space<vmem>>, vector<1x4x144xbf16>
    %43 = vector.shape_cast %42 : vector<1x4x144xbf16> to vector<4x144xbf16>
    %cst_44 = arith.constant dense<0.000000e+00> : vector<4x144xf32>
    %44 = tpu.matmul %37, %43, %cst_44 {dimension_numbers = #tpu.dot_dimension_numbers<[1], [0], [0], [1], [0, 0, 1, 1], [], []>} : vector<4x4xbf16>, vector<4x144xbf16>, vector<4x144xf32> -> vector<4x144xf32>
    %45 = arith.addf %35, %44 : vector<4x144xf32>
    %c4 = arith.constant 4 : index
    %c0_45 = arith.constant 0 : index
    %c0_46 = arith.constant 0 : index
    %46 = vector.load %arg3[%c4, %c0_45, %c0_46] : memref<9x4x4xbf16, #tpu.memory_space<vmem>>, vector<1x4x4xbf16>
    %47 = vector.shape_cast %46 : vector<1x4x4xbf16> to vector<4x4xbf16>
    %c0_47 = arith.constant 0 : index
    %c0_48 = arith.constant 0 : index
    %c10_49 = arith.constant 10 : index
    %48 = vector.load %arg1[%c0_47, %c0_48, %c10_49] : memref<1x4x256xbf16, #tpu.memory_space<vmem>>, vector<1x4x144xbf16>
    %49 = vector.shape_cast %48 : vector<1x4x144xbf16> to vector<4x144xbf16>
    %cst_50 = arith.constant dense<0.000000e+00> : vector<4x144xf32>
    %50 = tpu.matmul %47, %49, %cst_50 {dimension_numbers = #tpu.dot_dimension_numbers<[1], [0], [0], [1], [0, 0, 1, 1], [], []>} : vector<4x4xbf16>, vector<4x144xbf16>, vector<4x144xf32> -> vector<4x144xf32>
    %51 = arith.addf %41, %50 : vector<4x144xf32>
    %c0_51 = arith.constant 0 : index
    %c0_52 = arith.constant 0 : index
    %c10_53 = arith.constant 10 : index
    %52 = vector.load %arg2[%c0_51, %c0_52, %c10_53] : memref<1x4x256xbf16, #tpu.memory_space<vmem>>, vector<1x4x144xbf16>
    %53 = vector.shape_cast %52 : vector<1x4x144xbf16> to vector<4x144xbf16>
    %cst_54 = arith.constant dense<0.000000e+00> : vector<4x144xf32>
    %54 = tpu.matmul %47, %53, %cst_54 {dimension_numbers = #tpu.dot_dimension_numbers<[1], [0], [0], [1], [0, 0, 1, 1], [], []>} : vector<4x4xbf16>, vector<4x144xbf16>, vector<4x144xf32> -> vector<4x144xf32>
    %55 = arith.addf %45, %54 : vector<4x144xf32>
    %c5 = arith.constant 5 : index
    %c0_55 = arith.constant 0 : index
    %c0_56 = arith.constant 0 : index
    %56 = vector.load %arg3[%c5, %c0_55, %c0_56] : memref<9x4x4xbf16, #tpu.memory_space<vmem>>, vector<1x4x4xbf16>
    %57 = vector.shape_cast %56 : vector<1x4x4xbf16> to vector<4x4xbf16>
    %c0_57 = arith.constant 0 : index
    %c0_58 = arith.constant 0 : index
    %c10_59 = arith.constant 10 : index
    %58 = vector.load %arg2[%c0_57, %c0_58, %c10_59] : memref<1x4x256xbf16, #tpu.memory_space<vmem>>, vector<1x4x144xbf16>
    %59 = vector.shape_cast %58 : vector<1x4x144xbf16> to vector<4x144xbf16>
    %cst_60 = arith.constant dense<0.000000e+00> : vector<4x144xf32>
    %60 = tpu.matmul %57, %59, %cst_60 {dimension_numbers = #tpu.dot_dimension_numbers<[1], [0], [0], [1], [0, 0, 1, 1], [], []>} : vector<4x4xbf16>, vector<4x144xbf16>, vector<4x144xf32> -> vector<4x144xf32>
    %61 = arith.addf %51, %60 : vector<4x144xf32>
    %c0_61 = arith.constant 0 : index
    %c0_62 = arith.constant 0 : index
    %c11 = arith.constant 11 : index
    %62 = vector.load %arg1[%c0_61, %c0_62, %c11] : memref<1x4x256xbf16, #tpu.memory_space<vmem>>, vector<1x4x144xbf16>
    %63 = vector.shape_cast %62 : vector<1x4x144xbf16> to vector<4x144xbf16>
    %cst_63 = arith.constant dense<0.000000e+00> : vector<4x144xf32>
    %64 = tpu.matmul %57, %63, %cst_63 {dimension_numbers = #tpu.dot_dimension_numbers<[1], [0], [0], [1], [0, 0, 1, 1], [], []>} : vector<4x4xbf16>, vector<4x144xbf16>, vector<4x144xf32> -> vector<4x144xf32>
    %65 = arith.addf %55, %64 : vector<4x144xf32>
    %c6 = arith.constant 6 : index
    %c0_64 = arith.constant 0 : index
    %c0_65 = arith.constant 0 : index
    %66 = vector.load %arg3[%c6, %c0_64, %c0_65] : memref<9x4x4xbf16, #tpu.memory_space<vmem>>, vector<1x4x4xbf16>
    %67 = vector.shape_cast %66 : vector<1x4x4xbf16> to vector<4x4xbf16>
    %c0_66 = arith.constant 0 : index
    %c0_67 = arith.constant 0 : index
    %c18 = arith.constant 18 : index
    %68 = vector.load %arg2[%c0_66, %c0_67, %c18] : memref<1x4x256xbf16, #tpu.memory_space<vmem>>, vector<1x4x144xbf16>
    %69 = vector.shape_cast %68 : vector<1x4x144xbf16> to vector<4x144xbf16>
    %cst_68 = arith.constant dense<0.000000e+00> : vector<4x144xf32>
    %70 = tpu.matmul %67, %69, %cst_68 {dimension_numbers = #tpu.dot_dimension_numbers<[1], [0], [0], [1], [0, 0, 1, 1], [], []>} : vector<4x4xbf16>, vector<4x144xbf16>, vector<4x144xf32> -> vector<4x144xf32>
    %71 = arith.addf %61, %70 : vector<4x144xf32>
    %c0_69 = arith.constant 0 : index
    %c0_70 = arith.constant 0 : index
    %c19 = arith.constant 19 : index
    %72 = vector.load %arg1[%c0_69, %c0_70, %c19] : memref<1x4x256xbf16, #tpu.memory_space<vmem>>, vector<1x4x144xbf16>
    %73 = vector.shape_cast %72 : vector<1x4x144xbf16> to vector<4x144xbf16>
    %cst_71 = arith.constant dense<0.000000e+00> : vector<4x144xf32>
    %74 = tpu.matmul %67, %73, %cst_71 {dimension_numbers = #tpu.dot_dimension_numbers<[1], [0], [0], [1], [0, 0, 1, 1], [], []>} : vector<4x4xbf16>, vector<4x144xbf16>, vector<4x144xf32> -> vector<4x144xf32>
    %75 = arith.addf %65, %74 : vector<4x144xf32>
    %c7 = arith.constant 7 : index
    %c0_72 = arith.constant 0 : index
    %c0_73 = arith.constant 0 : index
    %76 = vector.load %arg3[%c7, %c0_72, %c0_73] : memref<9x4x4xbf16, #tpu.memory_space<vmem>>, vector<1x4x4xbf16>
    %77 = vector.shape_cast %76 : vector<1x4x4xbf16> to vector<4x4xbf16>
    %c0_74 = arith.constant 0 : index
    %c0_75 = arith.constant 0 : index
    %c19_76 = arith.constant 19 : index
    %78 = vector.load %arg1[%c0_74, %c0_75, %c19_76] : memref<1x4x256xbf16, #tpu.memory_space<vmem>>, vector<1x4x144xbf16>
    %79 = vector.shape_cast %78 : vector<1x4x144xbf16> to vector<4x144xbf16>
    %cst_77 = arith.constant dense<0.000000e+00> : vector<4x144xf32>
    %80 = tpu.matmul %77, %79, %cst_77 {dimension_numbers = #tpu.dot_dimension_numbers<[1], [0], [0], [1], [0, 0, 1, 1], [], []>} : vector<4x4xbf16>, vector<4x144xbf16>, vector<4x144xf32> -> vector<4x144xf32>
    %81 = arith.addf %71, %80 : vector<4x144xf32>
    %c0_78 = arith.constant 0 : index
    %c0_79 = arith.constant 0 : index
    %c19_80 = arith.constant 19 : index
    %82 = vector.load %arg2[%c0_78, %c0_79, %c19_80] : memref<1x4x256xbf16, #tpu.memory_space<vmem>>, vector<1x4x144xbf16>
    %83 = vector.shape_cast %82 : vector<1x4x144xbf16> to vector<4x144xbf16>
    %cst_81 = arith.constant dense<0.000000e+00> : vector<4x144xf32>
    %84 = tpu.matmul %77, %83, %cst_81 {dimension_numbers = #tpu.dot_dimension_numbers<[1], [0], [0], [1], [0, 0, 1, 1], [], []>} : vector<4x4xbf16>, vector<4x144xbf16>, vector<4x144xf32> -> vector<4x144xf32>
    %85 = arith.addf %75, %84 : vector<4x144xf32>
    %c8 = arith.constant 8 : index
    %c0_82 = arith.constant 0 : index
    %c0_83 = arith.constant 0 : index
    %86 = vector.load %arg3[%c8, %c0_82, %c0_83] : memref<9x4x4xbf16, #tpu.memory_space<vmem>>, vector<1x4x4xbf16>
    %87 = vector.shape_cast %86 : vector<1x4x4xbf16> to vector<4x4xbf16>
    %c0_84 = arith.constant 0 : index
    %c0_85 = arith.constant 0 : index
    %c19_86 = arith.constant 19 : index
    %88 = vector.load %arg2[%c0_84, %c0_85, %c19_86] : memref<1x4x256xbf16, #tpu.memory_space<vmem>>, vector<1x4x144xbf16>
    %89 = vector.shape_cast %88 : vector<1x4x144xbf16> to vector<4x144xbf16>
    %cst_87 = arith.constant dense<0.000000e+00> : vector<4x144xf32>
    %90 = tpu.matmul %87, %89, %cst_87 {dimension_numbers = #tpu.dot_dimension_numbers<[1], [0], [0], [1], [0, 0, 1, 1], [], []>} : vector<4x4xbf16>, vector<4x144xbf16>, vector<4x144xf32> -> vector<4x144xf32>
    %91 = arith.addf %81, %90 : vector<4x144xf32>
    %c0_88 = arith.constant 0 : index
    %c0_89 = arith.constant 0 : index
    %c20 = arith.constant 20 : index
    %92 = vector.load %arg1[%c0_88, %c0_89, %c20] : memref<1x4x256xbf16, #tpu.memory_space<vmem>>, vector<1x4x144xbf16>
    %93 = vector.shape_cast %92 : vector<1x4x144xbf16> to vector<4x144xbf16>
    %cst_90 = arith.constant dense<0.000000e+00> : vector<4x144xf32>
    %94 = tpu.matmul %87, %93, %cst_90 {dimension_numbers = #tpu.dot_dimension_numbers<[1], [0], [0], [1], [0, 0, 1, 1], [], []>} : vector<4x4xbf16>, vector<4x144xbf16>, vector<4x144xf32> -> vector<4x144xf32>
    %95 = arith.addf %85, %94 : vector<4x144xf32>
    %c0_91 = arith.constant 0 : index
    %c0_92 = arith.constant 0 : index
    %96 = vector.load %arg5[%c0_91, %c0_92] : memref<4x1xf32, #tpu.memory_space<vmem>>, vector<4x1xf32>
    %97 = vector.broadcast %96 : vector<4x1xf32> to vector<4x144xf32>
    %98 = arith.addf %91, %97 : vector<4x144xf32>
    %cst_93 = arith.constant 0.000000e+00 : f32
    %99 = vector.broadcast %cst_93 : f32 to vector<4x144xf32>
    %100 = arith.maximumf %98, %99 : vector<4x144xf32>
    %c0_94 = arith.constant 0 : index
    %c0_95 = arith.constant 0 : index
    %101 = vector.load %arg7[%c0_94, %c0_95] : memref<2x144xf32, #tpu.memory_space<vmem>>, vector<1x144xf32>
    %102 = vector.broadcast %101 : vector<1x144xf32> to vector<4x144xf32>
    %103 = arith.mulf %100, %102 : vector<4x144xf32>
    %104 = vector.broadcast %96 : vector<4x1xf32> to vector<4x144xf32>
    %105 = arith.addf %95, %104 : vector<4x144xf32>
    %cst_96 = arith.constant 0.000000e+00 : f32
    %106 = vector.broadcast %cst_96 : f32 to vector<4x144xf32>
    %107 = arith.maximumf %105, %106 : vector<4x144xf32>
    %c1_97 = arith.constant 1 : index
    %c0_98 = arith.constant 0 : index
    %108 = vector.load %arg7[%c1_97, %c0_98] : memref<2x144xf32, #tpu.memory_space<vmem>>, vector<1x144xf32>
    %109 = vector.broadcast %108 : vector<1x144xf32> to vector<4x144xf32>
    %110 = arith.mulf %107, %109 : vector<4x144xf32>
    %111 = arith.truncf %103 : vector<4x144xf32> to vector<4x144xbf16>
    %c0_99 = arith.constant 0 : index
    %c9_100 = arith.constant 9 : index
    %112 = vector.load %arg9[%c0_99, %c9_100] : memref<4x256xbf16, #tpu.memory_space<vmem>>, vector<4x144xbf16>
    tpu.vector_store %arg9[%c0_99, %c9_100], %111 {strides = array<i32>} : memref<4x256xbf16, #tpu.memory_space<vmem>>, vector<4x144xbf16>,
    %113 = arith.truncf %110 : vector<4x144xf32> to vector<4x144xbf16>
    %c0_101 = arith.constant 0 : index
    %c9_102 = arith.constant 9 : index
    %114 = vector.load %arg10[%c0_101, %c9_102] : memref<4x256xbf16, #tpu.memory_space<vmem>>, vector<4x144xbf16>
    tpu.vector_store %arg10[%c0_101, %c9_102], %113 {strides = array<i32>} : memref<4x256xbf16, #tpu.memory_space<vmem>>, vector<4x144xbf16>,
    %cst_103 = arith.constant 0.000000e+00 : f32
    %115 = vector.broadcast %cst_103 : f32 to vector<4x144xf32>
    %c0_104 = arith.constant 0 : index
    %c0_105 = arith.constant 0 : index
    %c0_106 = arith.constant 0 : index
    %116 = vector.load %arg4[%c0_104, %c0_105, %c0_106] : memref<9x4x4xbf16, #tpu.memory_space<vmem>>, vector<1x4x4xbf16>
    %117 = vector.shape_cast %116 : vector<1x4x4xbf16> to vector<4x4xbf16>
    %c0_107 = arith.constant 0 : index
    %c0_108 = arith.constant 0 : index
    %118 = vector.load %arg9[%c0_107, %c0_108] : memref<4x256xbf16, #tpu.memory_space<vmem>>, vector<4x144xbf16>
    %cst_109 = arith.constant dense<0.000000e+00> : vector<4x144xf32>
    %119 = tpu.matmul %117, %118, %cst_109 {dimension_numbers = #tpu.dot_dimension_numbers<[1], [0], [0], [1], [0, 0, 1, 1], [], []>} : vector<4x4xbf16>, vector<4x144xbf16>, vector<4x144xf32> -> vector<4x144xf32>
    %120 = arith.addf %115, %119 : vector<4x144xf32>
    %c1_110 = arith.constant 1 : index
    %c0_111 = arith.constant 0 : index
    %c0_112 = arith.constant 0 : index
    %121 = vector.load %arg4[%c1_110, %c0_111, %c0_112] : memref<9x4x4xbf16, #tpu.memory_space<vmem>>, vector<1x4x4xbf16>
    %122 = vector.shape_cast %121 : vector<1x4x4xbf16> to vector<4x4xbf16>
    %c0_113 = arith.constant 0 : index
    %c0_114 = arith.constant 0 : index
    %123 = vector.load %arg10[%c0_113, %c0_114] : memref<4x256xbf16, #tpu.memory_space<vmem>>, vector<4x144xbf16>
    %cst_115 = arith.constant dense<0.000000e+00> : vector<4x144xf32>
    %124 = tpu.matmul %122, %123, %cst_115 {dimension_numbers = #tpu.dot_dimension_numbers<[1], [0], [0], [1], [0, 0, 1, 1], [], []>} : vector<4x4xbf16>, vector<4x144xbf16>, vector<4x144xf32> -> vector<4x144xf32>
    %125 = arith.addf %120, %124 : vector<4x144xf32>
    %c2_116 = arith.constant 2 : index
    %c0_117 = arith.constant 0 : index
    %c0_118 = arith.constant 0 : index
    %126 = vector.load %arg4[%c2_116, %c0_117, %c0_118] : memref<9x4x4xbf16, #tpu.memory_space<vmem>>, vector<1x4x4xbf16>
    %127 = vector.shape_cast %126 : vector<1x4x4xbf16> to vector<4x4xbf16>
    %c0_119 = arith.constant 0 : index
    %c1_120 = arith.constant 1 : index
    %128 = vector.load %arg9[%c0_119, %c1_120] : memref<4x256xbf16, #tpu.memory_space<vmem>>, vector<4x144xbf16>
    %cst_121 = arith.constant dense<0.000000e+00> : vector<4x144xf32>
    %129 = tpu.matmul %127, %128, %cst_121 {dimension_numbers = #tpu.dot_dimension_numbers<[1], [0], [0], [1], [0, 0, 1, 1], [], []>} : vector<4x4xbf16>, vector<4x144xbf16>, vector<4x144xf32> -> vector<4x144xf32>
    %130 = arith.addf %125, %129 : vector<4x144xf32>
    %c3_122 = arith.constant 3 : index
    %c0_123 = arith.constant 0 : index
    %c0_124 = arith.constant 0 : index
    %131 = vector.load %arg4[%c3_122, %c0_123, %c0_124] : memref<9x4x4xbf16, #tpu.memory_space<vmem>>, vector<1x4x4xbf16>
    %132 = vector.shape_cast %131 : vector<1x4x4xbf16> to vector<4x4xbf16>
    %c0_125 = arith.constant 0 : index
    %c9_126 = arith.constant 9 : index
    %133 = vector.load %arg9[%c0_125, %c9_126] : memref<4x256xbf16, #tpu.memory_space<vmem>>, vector<4x144xbf16>
    %cst_127 = arith.constant dense<0.000000e+00> : vector<4x144xf32>
    %134 = tpu.matmul %132, %133, %cst_127 {dimension_numbers = #tpu.dot_dimension_numbers<[1], [0], [0], [1], [0, 0, 1, 1], [], []>} : vector<4x4xbf16>, vector<4x144xbf16>, vector<4x144xf32> -> vector<4x144xf32>
    %135 = arith.addf %130, %134 : vector<4x144xf32>
    %c4_128 = arith.constant 4 : index
    %c0_129 = arith.constant 0 : index
    %c0_130 = arith.constant 0 : index
    %136 = vector.load %arg4[%c4_128, %c0_129, %c0_130] : memref<9x4x4xbf16, #tpu.memory_space<vmem>>, vector<1x4x4xbf16>
    %137 = vector.shape_cast %136 : vector<1x4x4xbf16> to vector<4x4xbf16>
    %c0_131 = arith.constant 0 : index
    %c9_132 = arith.constant 9 : index
    %138 = vector.load %arg10[%c0_131, %c9_132] : memref<4x256xbf16, #tpu.memory_space<vmem>>, vector<4x144xbf16>
    %cst_133 = arith.constant dense<0.000000e+00> : vector<4x144xf32>
    %139 = tpu.matmul %137, %138, %cst_133 {dimension_numbers = #tpu.dot_dimension_numbers<[1], [0], [0], [1], [0, 0, 1, 1], [], []>} : vector<4x4xbf16>, vector<4x144xbf16>, vector<4x144xf32> -> vector<4x144xf32>
    %140 = arith.addf %135, %139 : vector<4x144xf32>
    %c5_134 = arith.constant 5 : index
    %c0_135 = arith.constant 0 : index
    %c0_136 = arith.constant 0 : index
    %141 = vector.load %arg4[%c5_134, %c0_135, %c0_136] : memref<9x4x4xbf16, #tpu.memory_space<vmem>>, vector<1x4x4xbf16>
    %142 = vector.shape_cast %141 : vector<1x4x4xbf16> to vector<4x4xbf16>
    %c0_137 = arith.constant 0 : index
    %c10_138 = arith.constant 10 : index
    %143 = vector.load %arg9[%c0_137, %c10_138] : memref<4x256xbf16, #tpu.memory_space<vmem>>, vector<4x144xbf16>
    %cst_139 = arith.constant dense<0.000000e+00> : vector<4x144xf32>
    %144 = tpu.matmul %142, %143, %cst_139 {dimension_numbers = #tpu.dot_dimension_numbers<[1], [0], [0], [1], [0, 0, 1, 1], [], []>} : vector<4x4xbf16>, vector<4x144xbf16>, vector<4x144xf32> -> vector<4x144xf32>
    %145 = arith.addf %140, %144 : vector<4x144xf32>
    %c6_140 = arith.constant 6 : index
    %c0_141 = arith.constant 0 : index
    %c0_142 = arith.constant 0 : index
    %146 = vector.load %arg4[%c6_140, %c0_141, %c0_142] : memref<9x4x4xbf16, #tpu.memory_space<vmem>>, vector<1x4x4xbf16>
    %147 = vector.shape_cast %146 : vector<1x4x4xbf16> to vector<4x4xbf16>
    %c0_143 = arith.constant 0 : index
    %c18_144 = arith.constant 18 : index
    %148 = vector.load %arg9[%c0_143, %c18_144] : memref<4x256xbf16, #tpu.memory_space<vmem>>, vector<4x144xbf16>
    %cst_145 = arith.constant dense<0.000000e+00> : vector<4x144xf32>
    %149 = tpu.matmul %147, %148, %cst_145 {dimension_numbers = #tpu.dot_dimension_numbers<[1], [0], [0], [1], [0, 0, 1, 1], [], []>} : vector<4x4xbf16>, vector<4x144xbf16>, vector<4x144xf32> -> vector<4x144xf32>
    %150 = arith.addf %145, %149 : vector<4x144xf32>
    %c7_146 = arith.constant 7 : index
    %c0_147 = arith.constant 0 : index
    %c0_148 = arith.constant 0 : index
    %151 = vector.load %arg4[%c7_146, %c0_147, %c0_148] : memref<9x4x4xbf16, #tpu.memory_space<vmem>>, vector<1x4x4xbf16>
    %152 = vector.shape_cast %151 : vector<1x4x4xbf16> to vector<4x4xbf16>
    %c0_149 = arith.constant 0 : index
    %c18_150 = arith.constant 18 : index
    %153 = vector.load %arg10[%c0_149, %c18_150] : memref<4x256xbf16, #tpu.memory_space<vmem>>, vector<4x144xbf16>
    %cst_151 = arith.constant dense<0.000000e+00> : vector<4x144xf32>
    %154 = tpu.matmul %152, %153, %cst_151 {dimension_numbers = #tpu.dot_dimension_numbers<[1], [0], [0], [1], [0, 0, 1, 1], [], []>} : vector<4x4xbf16>, vector<4x144xbf16>, vector<4x144xf32> -> vector<4x144xf32>
    %155 = arith.addf %150, %154 : vector<4x144xf32>
    %c8_152 = arith.constant 8 : index
    %c0_153 = arith.constant 0 : index
    %c0_154 = arith.constant 0 : index
    %156 = vector.load %arg4[%c8_152, %c0_153, %c0_154] : memref<9x4x4xbf16, #tpu.memory_space<vmem>>, vector<1x4x4xbf16>
    %157 = vector.shape_cast %156 : vector<1x4x4xbf16> to vector<4x4xbf16>
    %c0_155 = arith.constant 0 : index
    %c19_156 = arith.constant 19 : index
    %158 = vector.load %arg9[%c0_155, %c19_156] : memref<4x256xbf16, #tpu.memory_space<vmem>>, vector<4x144xbf16>
    %cst_157 = arith.constant dense<0.000000e+00> : vector<4x144xf32>
    %159 = tpu.matmul %157, %158, %cst_157 {dimension_numbers = #tpu.dot_dimension_numbers<[1], [0], [0], [1], [0, 0, 1, 1], [], []>} : vector<4x4xbf16>, vector<4x144xbf16>, vector<4x144xf32> -> vector<4x144xf32>
    %160 = arith.addf %155, %159 : vector<4x144xf32>
    %c0_158 = arith.constant 0 : index
    %c0_159 = arith.constant 0 : index
    %c10_160 = arith.constant 10 : index
    %161 = vector.load %arg2[%c0_158, %c0_159, %c10_160] : memref<1x4x256xbf16, #tpu.memory_space<vmem>>, vector<1x4x144xbf16>
    %162 = vector.shape_cast %161 : vector<1x4x144xbf16> to vector<4x144xbf16>
    %c0_161 = arith.constant 0 : index
    %c0_162 = arith.constant 0 : index
    %c19_163 = arith.constant 19 : index
    %163 = vector.load %arg2[%c0_161, %c0_162, %c19_163] : memref<1x4x256xbf16, #tpu.memory_space<vmem>>, vector<1x4x144xbf16>
    %164 = vector.shape_cast %163 : vector<1x4x144xbf16> to vector<4x144xbf16>
    %165 = arith.maximumf %162, %164 : vector<4x144xbf16>
    %c0_164 = arith.constant 0 : index
    %c0_165 = arith.constant 0 : index
    %c11_166 = arith.constant 11 : index
    %166 = vector.load %arg1[%c0_164, %c0_165, %c11_166] : memref<1x4x256xbf16, #tpu.memory_space<vmem>>, vector<1x4x144xbf16>
    %167 = vector.shape_cast %166 : vector<1x4x144xbf16> to vector<4x144xbf16>
    %c0_167 = arith.constant 0 : index
    %c0_168 = arith.constant 0 : index
    %c20_169 = arith.constant 20 : index
    %168 = vector.load %arg1[%c0_167, %c0_168, %c20_169] : memref<1x4x256xbf16, #tpu.memory_space<vmem>>, vector<1x4x144xbf16>
    %169 = vector.shape_cast %168 : vector<1x4x144xbf16> to vector<4x144xbf16>
    %170 = arith.maximumf %167, %169 : vector<4x144xbf16>
    %171 = arith.maximumf %165, %170 : vector<4x144xbf16>
    %c0_170 = arith.constant 0 : index
    %c0_171 = arith.constant 0 : index
    %172 = vector.load %arg6[%c0_170, %c0_171] : memref<4x1xf32, #tpu.memory_space<vmem>>, vector<4x1xf32>
    %173 = vector.broadcast %172 : vector<4x1xf32> to vector<4x144xf32>
    %174 = arith.addf %160, %173 : vector<4x144xf32>
    %175 = arith.extf %171 : vector<4x144xbf16> to vector<4x144xf32>
    %176 = arith.addf %174, %175 : vector<4x144xf32>
    %cst_172 = arith.constant 0.000000e+00 : f32
    %177 = vector.broadcast %cst_172 : f32 to vector<4x144xf32>
    %178 = arith.maximumf %176, %177 : vector<4x144xf32>
    %179 = arith.truncf %178 : vector<4x144xf32> to vector<4x144xbf16>
    %c0_173 = arith.constant 0 : index
    %c0_174 = arith.constant 0 : index
    %c0_175 = arith.constant 0 : index
    %180 = vector.load %arg8[%c0_173, %c0_174, %c0_175] : memref<1x4x144xbf16, #tpu.memory_space<vmem>>, vector<1x4x144xbf16>
    %181 = vector.shape_cast %180 : vector<1x4x144xbf16> to vector<4x144xbf16>
    %182 = vector.shape_cast %179 : vector<4x144xbf16> to vector<1x4x144xbf16>
    tpu.vector_store %arg8[%c0_173, %c0_174, %c0_175], %182 {strides = array<i32>} : memref<1x4x144xbf16, #tpu.memory_space<vmem>>, vector<1x4x144xbf16>,
    return
  }
  func.func @transform_0(%arg0: i32) -> (i32, i32, i32) {
    %c0_i32 = arith.constant 0 : i32
    %c0_i32_0 = arith.constant 0 : i32
    %c0_i32_1 = arith.constant 0 : i32
    return %arg0, %c0_i32, %c0_i32_0 : i32, i32, i32
  }
  func.func @transform_1(%arg0: i32) -> (i32, i32, i32) {
    %c0_i32 = arith.constant 0 : i32
    %c0_i32_0 = arith.constant 0 : i32
    %c0_i32_1 = arith.constant 0 : i32
    return %arg0, %c0_i32, %c0_i32_0 : i32, i32, i32
  }
  func.func @transform_2(%arg0: i32) -> (i32, i32, i32) {
    %c0_i32 = arith.constant 0 : i32
    %c0_i32_0 = arith.constant 0 : i32
    %c0_i32_1 = arith.constant 0 : i32
    %c0_i32_2 = arith.constant 0 : i32
    return %c0_i32, %c0_i32_0, %c0_i32_1 : i32, i32, i32
  }
  func.func @transform_3(%arg0: i32) -> (i32, i32, i32) {
    %c0_i32 = arith.constant 0 : i32
    %c0_i32_0 = arith.constant 0 : i32
    %c0_i32_1 = arith.constant 0 : i32
    %c0_i32_2 = arith.constant 0 : i32
    return %c0_i32, %c0_i32_0, %c0_i32_1 : i32, i32, i32
  }
  func.func @transform_4(%arg0: i32) -> (i32, i32) {
    %c0_i32 = arith.constant 0 : i32
    %c0_i32_0 = arith.constant 0 : i32
    %c0_i32_1 = arith.constant 0 : i32
    return %c0_i32, %c0_i32_0 : i32, i32
  }
  func.func @transform_5(%arg0: i32) -> (i32, i32) {
    %c0_i32 = arith.constant 0 : i32
    %c0_i32_0 = arith.constant 0 : i32
    %c0_i32_1 = arith.constant 0 : i32
    return %c0_i32, %c0_i32_0 : i32, i32
  }
  func.func @transform_6(%arg0: i32) -> (i32, i32) {
    %c0_i32 = arith.constant 0 : i32
    %c0_i32_0 = arith.constant 0 : i32
    %c0_i32_1 = arith.constant 0 : i32
    return %c0_i32, %c0_i32_0 : i32, i32
  }
  func.func @transform_7(%arg0: i32) -> (i32, i32, i32) {
    %c0_i32 = arith.constant 0 : i32
    %c0_i32_0 = arith.constant 0 : i32
    %c0_i32_1 = arith.constant 0 : i32
    return %arg0, %c0_i32, %c0_i32_0 : i32, i32, i32
  }
}

</mosaic_0001>

<bundles_post_ra>
// kernel: basic_block_forward.1
= control target key start
LH: loop header
LB: loop body
LE: loop exit
PB: predicated region body
PF: predicated region fallthrough
CT: control target
= control target key end

     0   :  { %s1978_s24 = smov 0   ;;  %s2296_s0 = inlined_call_operand.vmem [shape: bf16[2,4,256], index: 0, kind: input, shape index: {}]   ;;  %s2297_s1 = inlined_call_operand.vmem [shape: bf16[2,4,256], index: 1, kind: input, shape index: {}]   ;;  %s2298_s2 = inlined_call_operand.vmem [shape: bf16[9,4,4], index: 2, kind: input, shape index: {}]   ;;  %s2299_s3 = inlined_call_operand.vmem [shape: bf16[9,4,4], index: 3, kind: input, shape index: {}]   ;;  %s2300_s4 = inlined_call_operand.vmem [shape: f32[4,1], index: 4, kind: input, shape index: {}]   ;;  %s2301_s5 = inlined_call_operand.vmem [shape: f32[4,1], index: 5, kind: input, shape index: {}]   ;;  %s2302_s6 = inlined_call_operand.vmem [shape: f32[2,144], index: 6, kind: input, shape index: {}]   ;;  %s2303_s7 = inlined_call_operand.vmem [shape: bf16[2,4,144], index: 7, kind: output, shape index: {}]  }
   0x1 LB: > { %s1803_s25 = sadd.s32 4294967295, %s1926_s24   ;;  %p1807_p0 = scmp.ge.s32.totalorder %s1926_s24, 1  ;;  %s1926_s24 = sphi %s1978_s24, %s17_s24  }
   0x2   : > { %p247_p1 = scmp.lt.s32.totalorder %s1926_s24, 3 }
   0x4   : > { %p248_p2 = pnand %p1807_p0, %p247_p1 }
   0x5   : > { %p284_p3 = scmp.lt.s32.totalorder (!%p248_p2), %s1803_s25, 1  ;;  %s1928_s10 = smov (!%p248_p2), 127  }
   0x6   : > { %251 = sbr.rel (%p248_p2) target bundleno = 981 (0x3d5), region = 48  ;;  %s1929_s11 = smov (!%p248_p2), 126  }
   0x7   : > { %s1930_s12 = smov (!%p248_p2), 118   ;;  %s1931_s13 = smov (!%p248_p2), 119  }
   0x8   : > { %s1932_s14 = smov (!%p248_p2), 117   ;;  %s1933_s17 = smov (!%p248_p2), 109  }
   0x9   : > { %s1934_s18 = smov (!%p248_p2), 110   ;;  %s1935_s21 = smov (!%p248_p2), 108  }
   0xa   : > { %s1937_s8 = smov (!%p248_p2), 9  }
   0xb   : > { %s2305_s25 = smov (!%p284_p3, %s1803_s25), 1  ;;  %vm323_vm0 = vcmask 1041408   ;;  %vm319_vm1 = vcmask 31744   ;;  %v2039_v38 = vld [vmem:[%s2298_s2] sm:$0x3]  ;;  %vm317_vm2 = vcmask 1039360  }
   0xc   : > { %s1986_s26 = sshll.u32 %s2305_s25, 2  ;;  %v1814_v56 = vld [vmem:[%s2298_s2 + $0x2] sm:$0x3]  ;;  %vm539_vm3 = vcmask 1031168   ;;  %vm638_vm4 = vcmask 965632   ;;  %vm588_vm5 = vcmask 973824  }
   0xd   : > { %s1992_s29 = scalar_lea.vmem %s2296_s0, %s1986_s26  ;;  %s1999_s9 = scalar_lea.vmem %s2297_s1, %s1986_s26  ;;  %vm829_vm6 = vcmask 957440   ;;  %vm928_vm7 = vcmask 891904   ;;  %vm878_vm8 = vcmask 900096   ;;  %vm1119_vm9 = vcmask 883712  }
   0xe   : > { %v304_v0 = vld [vmem:[%s1992_s29] sm:$0xf]  ;;  %vm1199_vm10 = vcmask 1041480   ;;  %vm1200_vm11 = vcmask 199682   ;;  %vm1196_vm12 = vcmask 72704   ;;  %vm1733_vm14 = vcmask 125954  }
   0xf   : > { %308 = vst [vmem:[#allocation1] ss:$4 sm:$0xff] %v304_v0  ;;  %v303_v1 = vld [vmem:[%s1999_s9] sm:$0xf]  ;;  %vm1201_vm13 = vmor %vm1200_vm11, %vm1199_vm10 }
  0x10   : > { %v393_v4 = vld [vmem:[%s1999_s9] sm:$0xf]  ;;  %vm1734_vm15 = vmor %vm1733_vm14, %vm323_vm0 }
  0x11   : > { %v528_v11 = vld [vmem:[%s1992_s29] sm:$0xf] }
  0x12   : > { %v577_v14 = vld [vmem:[%s1999_s9] sm:$0xf] }
  0x13   : > { %v627_v17 = vld [vmem:[%s1992_s29] sm:$0xf] }
  0x14   : > { %v723_v22 = vld [vmem:[%s1999_s9] sm:$0xf] }
  0x15   : > { %v818_v27 = vld [vmem:[%s1992_s29] sm:$0xf] }
  0x16   : > { %v309_v2 = vld.sshfl [vmem:[#allocation1] sm:$0xff pattern:$0x73625140]  ;;  %v311_v3 = vld.sshfl [vmem:[#allocation1 + $0x8] sm:$0xff pattern:$0x73625140] }
  0x17   : > { %313 = vrot.lane.b32.xlu0 %v309_v2, %s1928_s10  ;;  %357 = vst [vmem:[#allocation1] ss:$4 sm:$0xff] %v303_v1  ;;  %v867_v30 = vld [vmem:[%s1999_s9] sm:$0xf] }
  0x18   : > { %v917_v33 = vld [vmem:[%s1992_s29] sm:$0xf] }
  0x19   : > { %v1013_v42 = vld [vmem:[%s1999_s9] sm:$0xf] }
  0x1a   : > { %v1108_v57 = vld [vmem:[%s1992_s29] sm:$0xf] }
  0x1e   : > { %v2004_v5 = vld.sshfl [vmem:[#allocation1] sm:$0xff pattern:$0x73625140]  ;;  %v2006_v6 = vld.sshfl [vmem:[#allocation1 + $0x8] sm:$0xff pattern:$0x73625140] }
  0x1f   : > { %315 = vrot.lane.b32.xlu0 %v311_v3, %s1928_s10  ;;  %395 = vst [vmem:[#allocation1] ss:$4 sm:$0xff] %v393_v4  ;;  %v365_v34 = vsel %vm323_vm0, %v2006_v6, 0  ;;  %v363_v35 = vsel %vm323_vm0, %v2004_v5, 0 }
  0x20   : > { %387 = vmatpush.bf16.msra.mxu3 %v365_v34  ;;  %374 = vmatpush.bf16.msra.mxu2 %v363_v35 }
  0x23   : > { %1818 = vmatmul.msk.bf16.vlgmr.msra.gmra.mxu3 %vm319_vm1, %v2039_v38  ;;  %1817 = vmatmul.msk.bf16.vlgmr.msra.gmra.mxu2 %vm319_vm1, %v2039_v38 }
  0x26   : > { %v396_v7 = vld.sshfl [vmem:[#allocation1] sm:$0xff pattern:$0x73625140]  ;;  %v398_v8 = vld.sshfl [vmem:[#allocation1 + $0x8] sm:$0xff pattern:$0x73625140] }
  0x27   : > { %437 = vst [vmem:[#allocation1] ss:$4 sm:$0xff] %v304_v0  ;;  %400 = vrot.lane.b32.xlu2 %v396_v7, %s1928_s10 }
  0x2e   : > { %v438_v9 = vld.sshfl [vmem:[#allocation1] sm:$0xff pattern:$0x73625140]  ;;  %v440_v10 = vld.sshfl [vmem:[#allocation1 + $0x8] sm:$0xff pattern:$0x73625140] }
  0x2f   : > { %442 = vrot.lane.b32.xlu1 %v438_v9, %s1928_s10  ;;  %481 = vst [vmem:[#allocation1] ss:$4 sm:$0xff] %v393_v4  ;;  %402 = vrot.lane.b32.xlu2 %v398_v8, %s1928_s10 }
  0x36   : > { %v482_v12 = vld.sshfl [vmem:[#allocation1] sm:$0xff pattern:$0x73625140]  ;;  %v484_v13 = vld.sshfl [vmem:[#allocation1 + $0x8] sm:$0xff pattern:$0x73625140] }
  0x37   : > { %444 = vrot.lane.b32.xlu1 %v440_v10, %s1928_s10  ;;  %530 = vst [vmem:[#allocation1] ss:$4 sm:$0xff] %v528_v11  ;;  %486 = vrot.lane.b32.xlu2 %v482_v12, %s1928_s10 }
  0x3e   : > { %v533_v15 = vld.sshfl [vmem:[#allocation1 + $0x8] sm:$0xff pattern:$0x73625140]  ;;  %v531_v16 = vld.sshfl [vmem:[#allocation1] sm:$0xff pattern:$0x73625140] }
  0x3f   : > { %537 = vrot.lane.b32.xlu1 %v533_v15, %s1929_s11  ;;  %535 = vrot.lane.b32.xlu0 %v531_v16, %s1929_s11  ;;  %579 = vst [vmem:[#allocation1] ss:$4 sm:$0xff] %v577_v14  ;;  %v1823_v15 = vld [vmem:[%s2298_s2 + $0x4] sm:$0x3] }
  0x46   : > { %v580_v18 = vld.sshfl [vmem:[#allocation1] sm:$0xff pattern:$0x73625140]  ;;  %v582_v19 = vld.sshfl [vmem:[#allocation1 + $0x8] sm:$0xff pattern:$0x73625140] }
  0x47   : > { %488 = vrot.lane.b32.xlu0 %v484_v13, %s1928_s10  ;;  %629 = vst [vmem:[#allocation1] ss:$4 sm:$0xff] %v627_v17 }
  0x4e   : > { %v630_v20 = vld.sshfl [vmem:[#allocation1] sm:$0xff pattern:$0x73625140]  ;;  %v632_v21 = vld.sshfl [vmem:[#allocation1 + $0x8] sm:$0xff pattern:$0x73625140] }
  0x4f   : > { %634 = vrot.lane.b32.xlu1 %v630_v20, %s1930_s12  ;;  %676 = vst [vmem:[#allocation1] ss:$4 sm:$0xff] %v627_v17  ;;  %584 = vrot.lane.b32.xlu0 %v580_v18, %s1931_s13 }
  0x50   : > { %636 = vrot.lane.b32.xlu2 %v632_v21, %s1930_s12 }
  0x56   : > { %v677_v23 = vld.sshfl [vmem:[#allocation1] sm:$0xff pattern:$0x73625140]  ;;  %v679_v24 = vld.sshfl [vmem:[#allocation1 + $0x8] sm:$0xff pattern:$0x73625140] }
  0x57   : > { %586 = vrot.lane.b32.xlu1 %v582_v19, %s1931_s13  ;;  %725 = vst [vmem:[#allocation1] ss:$4 sm:$0xff] %v723_v22 }
  0x5e   : > { %v728_v25 = vld.sshfl [vmem:[#allocation1 + $0x8] sm:$0xff pattern:$0x73625140]  ;;  %v726_v26 = vld.sshfl [vmem:[#allocation1] sm:$0xff pattern:$0x73625140] }
  0x5f   : > { %732 = vrot.lane.b32.xlu0 %v728_v25, %s1930_s12  ;;  %771 = vst [vmem:[#allocation1] ss:$4 sm:$0xff] %v723_v22  ;;  %681 = vrot.lane.b32.xlu1 %v677_v23, %s1930_s12 }
  0x60   : > { %730 = vrot.lane.b32.xlu2 %v726_v26, %s1930_s12 }
  0x66   : > { %v772_v28 = vld.sshfl [vmem:[#allocation1] sm:$0xff pattern:$0x73625140]  ;;  %v774_v29 = vld.sshfl [vmem:[#allocation1 + $0x8] sm:$0xff pattern:$0x73625140] }
  0x67   : > { %820 = vst [vmem:[#allocation1] ss:$4 sm:$0xff] %v818_v27  ;;  %v1828_v27 = vld [vmem:[%s2298_s2 + $0x6] sm:$0x3] }
  0x68   : > { %683 = vrot.lane.b32.xlu2 %v679_v24, %s1930_s12 }
  0x6e   : > { %v823_v31 = vld.sshfl [vmem:[#allocation1 + $0x8] sm:$0xff pattern:$0x73625140]  ;;  %v821_v32 = vld.sshfl [vmem:[#allocation1] sm:$0xff pattern:$0x73625140] }
  0x6f   : > { %827 = vrot.lane.b32.xlu1 %v823_v31, %s1932_s14  ;;  %825 = vrot.lane.b32.xlu0 %v821_v32, %s1932_s14  ;;  %869 = vst [vmem:[#allocation1] ss:$4 sm:$0xff] %v867_v30 }
  0x70   : > { %776 = vrot.lane.b32.xlu2 %v772_v28, %s1930_s12 }
  0x76   : > { %v870_v36 = vld.sshfl [vmem:[#allocation1] sm:$0xff pattern:$0x73625140]  ;;  %v872_v37 = vld.sshfl [vmem:[#allocation1 + $0x8] sm:$0xff pattern:$0x73625140] }
  0x77   : > { %919 = vst [vmem:[#allocation1] ss:$4 sm:$0xff] %v917_v33  ;;  %778 = vrot.lane.b32.xlu0 %v774_v29, %s1930_s12 }
  0x7e   : > { %v920_v39 = vld.sshfl [vmem:[#allocation1] sm:$0xff pattern:$0x73625140]  ;;  %v922_v40 = vld.sshfl [vmem:[#allocation1 + $0x8] sm:$0xff pattern:$0x73625140] }
  0x7f   : > { %924 = vrot.lane.b32.xlu1 %v920_v39, %s1933_s17  ;;  %966 = vst [vmem:[#allocation1] ss:$4 sm:$0xff] %v917_v33  ;;  %874 = vrot.lane.b32.xlu0 %v870_v36, %s1934_s18  ;;  %v1833_v36 = vld [vmem:[%s2298_s2 + $0x8] sm:$0x3] }
  0x80   : > { %926 = vrot.lane.b32.xlu2 %v922_v40, %s1933_s17 }
  0x81   : > { %v401_v41 = vpop.permute.xlu2 %400 }
  0x86   : > { %v967_v43 = vld.sshfl [vmem:[#allocation1] sm:$0xff pattern:$0x73625140]  ;;  %v969_v44 = vld.sshfl [vmem:[#allocation1 + $0x8] sm:$0xff pattern:$0x73625140] }
  0x87   : > { %1015 = vst [vmem:[#allocation1] ss:$4 sm:$0xff] %v1013_v42  ;;  %876 = vrot.lane.b32.xlu1 %v872_v37, %s1934_s18 }
  0x89   : > { %v314_v45 = vpop.permute.xlu0 %313  ;;  %v403_v46 = vpop.permute.xlu2 %402 }
  0x8a   : > { %v404_v49 = vsel %vm317_vm2, %v401_v41, %v403_v46  ;;  %v409_v51 = vsel %vm323_vm0, %v403_v46, 0 }
  0x8b   : > { %v406_v54 = vsel %vm323_vm0, %v404_v49, 0 }
  0x8e   : > { %v1018_v47 = vld.sshfl [vmem:[#allocation1 + $0x8] sm:$0xff pattern:$0x73625140]  ;;  %v1016_v48 = vld.sshfl [vmem:[#allocation1] sm:$0xff pattern:$0x73625140] }
  0x8f   : > { %1022 = vrot.lane.b32.xlu0 %v1018_v47, %s1933_s17  ;;  %1061 = vst [vmem:[#allocation1] ss:$4 sm:$0xff] %v1013_v42  ;;  %971 = vrot.lane.b32.xlu1 %v967_v43, %s1933_s17 }
  0x90   : > { %1020 = vrot.lane.b32.xlu2 %v1016_v48, %s1933_s17  ;;  %v1838_v48 = vld [vmem:[%s2298_s2 + $0xa] sm:$0x3] }
  0x91   : > { %v316_v50 = vpop.permute.xlu0 %315  ;;  %v487_v63 = vpop.permute.xlu2 %486 }
  0x92   : > { %v328_v52 = vsel %vm323_vm0, %v316_v50, 0  ;;  %v318_v53 = vsel %vm317_vm2, %v314_v45, %v316_v50 }
  0x93   : > { %350 = vmatpush.bf16.msra.mxu1 %v328_v52  ;;  %v325_v55 = vsel %vm323_vm0, %v318_v53, 0 }
  0x94   : > { %337 = vmatpush.bf16.msra.mxu0 %v325_v55 }
  0x96   : > { %v1062_v58 = vld.sshfl [vmem:[#allocation1] sm:$0xff pattern:$0x73625140]  ;;  %v1064_v59 = vld.sshfl [vmem:[#allocation1 + $0x8] sm:$0xff pattern:$0x73625140]  ;;  %1816 = vmatmul.msk.bf16.vlgmr.msra.gmra.mxu1 %vm319_vm1, %v1814_v56 }
  0x97   : > { %431 = vmatpush.bf16.msrb.mxu1 %v409_v51  ;;  %1110 = vst [vmem:[#allocation1] ss:$4 sm:$0xff] %v1108_v57  ;;  %1815 = vmatmul.msk.bf16.vlgmr.msra.gmra.mxu0 %vm319_vm1, %v1814_v56 }
  0x98   : > { %418 = vmatpush.bf16.msrb.mxu0 %v406_v54  ;;  %973 = vrot.lane.b32.xlu2 %v969_v44, %s1933_s17 }
  0x9e   : > { %v1113_v60 = vld.sshfl [vmem:[#allocation1 + $0x8] sm:$0xff pattern:$0x73625140]  ;;  %v1111_v61 = vld.sshfl [vmem:[#allocation1] sm:$0xff pattern:$0x73625140] }
  0x9f   : > { %1117 = vrot.lane.b32.xlu1 %v1113_v60, %s1935_s21  ;;  %1115 = vrot.lane.b32.xlu0 %v1111_v61, %s1935_s21  ;;  %v1843_v60 = vld [vmem:[%s2298_s2 + $0xc] sm:$0x3] }
  0xa0   : > { %1066 = vrot.lane.b32.xlu2 %v1062_v58, %s1933_s17 }
  0xa1   : > { %v443_v62 = vpop.permute.xlu1 %442 }
  0xa6   : > { %1820 = vmatmul.msk.bf16.vlgmr.msrb.gmra.mxu1 %vm319_vm1, %v1814_v56  ;;  %v389_v61 = vpop.f32.mrf.mxu3 }
  0xa7   : > { %1068 = vrot.lane.b32.xlu0 %v1064_v59, %s1933_s17  ;;  %1819 = vmatmul.msk.bf16.vlgmr.msrb.gmra.mxu0 %vm319_vm1, %v1814_v56 }
  0xa9   : > { %v445_v0 = vpop.permute.xlu1 %444 }
  0xaa   : > { %v451_v1 = vsel %vm323_vm0, %v445_v0, 0  ;;  %v446_v2 = vsel %vm317_vm2, %v443_v62, %v445_v0  ;;  %v637_v4 = vpop.permute.xlu2 %636  ;;  %v376_v62 = vpop.f32.mrf.mxu2 }
  0xab   : > { %473 = vmatpush.bf16.msrb.mxu3 %v451_v1  ;;  %v448_v3 = vsel %vm323_vm0, %v446_v2, 0  ;;  %v644_v7 = vsel %vm323_vm0, %v637_v4, 0 }
  0xac   : > { %460 = vmatpush.bf16.msrb.mxu2 %v448_v3 }
  0xae   : > { %1822 = vmatmul.msk.bf16.vlgmr.msrb.gmra.mxu3 %vm319_vm1, %v2039_v38 }
  0xaf   : > { %1821 = vmatmul.msk.bf16.vlgmr.msrb.gmra.mxu2 %vm319_vm1, %v2039_v38 }
  0xb1   : > { %v538_v5 = vpop.permute.xlu1 %537  ;;  %v536_v6 = vpop.permute.xlu0 %535 }
  0xb2   : > { %v545_v8 = vsel %vm323_vm0, %v538_v5, 0  ;;  %v540_v9 = vsel %vm539_vm3, %v536_v6, %v538_v5 }
  0xb3   : > { %v542_v10 = vsel %vm323_vm0, %v540_v9, 0  ;;  %567 = vmatpush.bf16.msra.mxu3 %v545_v8  ;;  %v391_v8 = vpop.f32.mrf.mxu3  ;;  %v378_v9 = vpop.f32.mrf.mxu2 }
  0xb4   : > { %554 = vmatpush.bf16.msra.mxu2 %v542_v10  ;;  %v1848_v10 = vld [vmem:[%s2298_s2 + $0xe] sm:$0x3] }
  0xb7   : > { %666 = vmatpush.bf16.msrb.mxu3 %v644_v7  ;;  %v1155_v7 = vld [vmem:[%s2300_s4] sm:$0xf] }
  0xb9   : > { %v489_v11 = vpop.permute.xlu0 %488 }
  0xba   : > { %v490_v12 = vsel %vm317_vm2, %v487_v63, %v489_v11  ;;  %v498_v13 = vsel %vm323_vm0, %v489_v11, 0  ;;  %v731_v16 = vpop.permute.xlu2 %730  ;;  %v1936_v63 = vmov 0  }
  0xbb   : > { %v495_v14 = vsel %vm323_vm0, %v490_v12, 0  ;;  %520 = vmatpush.bf16.msra.mxu1 %v498_v13  ;;  %1908 = vset.pattern.permute.xlu1 %v1936_v63  ;;  %300 = vst [vmem:[#allocation2] sm:$0xf] %v1936_v63 }
  0xbc   : > { %507 = vmatpush.bf16.msra.mxu0 %v495_v14  ;;  %1914 = vset.pattern.permute.xlu0 %v1936_v63  ;;  %301 = vst [vmem:[#allocation3] sm:$0xf] %v1936_v63 }
  0xbd   : > { %1158 = vperm.xlu1 %1908, %v1155_v7  }
  0xbe   : > { %1825 = vmatmul.msk.bf16.vlgmr.msra.gmra.mxu1 %vm319_vm1, %v1823_v15  ;;  %1827 = vmatmul.msk.bf16.vlgmr.msra.gmra.mxu3 %vm319_vm1, %v1823_v15 }
  0xbf   : > { %1824 = vmatmul.msk.bf16.vlgmr.msra.gmra.mxu0 %vm319_vm1, %v1823_v15  ;;  %1826 = vmatmul.msk.bf16.vlgmr.msra.gmra.mxu2 %vm319_vm1, %v1823_v15 }
  0xc1   : > { %v635_v17 = vpop.permute.xlu1 %634  ;;  %v585_v21 = vpop.permute.xlu0 %584 }
  0xc2   : > { %v639_v18 = vsel %vm638_vm4, %v635_v17, %v637_v4  ;;  %v684_v20 = vpop.permute.xlu2 %683 }
  0xc3   : > { %v641_v19 = vsel %vm323_vm0, %v639_v18, 0  ;;  %v693_v23 = vsel %vm323_vm0, %v684_v20, 0 }
  0xc4   : > { %653 = vmatpush.bf16.msrb.mxu2 %v641_v19 }
  0xc9   : > { %v587_v22 = vpop.permute.xlu1 %586 }
  0xca   : > { %v589_v24 = vsel %vm588_vm5, %v585_v21, %v587_v22  ;;  %v597_v25 = vsel %vm323_vm0, %v587_v22, 0  ;;  %v777_v35 = vpop.permute.xlu2 %776 }
  0xcb   : > { %v594_v26 = vsel %vm323_vm0, %v589_v24, 0  ;;  %619 = vmatpush.bf16.msrb.mxu1 %v597_v25  ;;  %v1853_v25 = vld [vmem:[%s2298_s2 + $0x10] sm:$0x3] }
  0xcc   : > { %606 = vmatpush.bf16.msrb.mxu0 %v594_v26 }
  0xce   : > { %1830 = vmatmul.msk.bf16.vlgmr.msrb.gmra.mxu1 %vm319_vm1, %v1828_v27  ;;  %1832 = vmatmul.msk.bf16.vlgmr.msrb.gmra.mxu3 %vm319_vm1, %v1828_v27 }
  0xcf   : > { %715 = vmatpush.bf16.msra.mxu1 %v693_v23  ;;  %1829 = vmatmul.msk.bf16.vlgmr.msrb.gmra.mxu0 %vm319_vm1, %v1828_v27 }
  0xd0   : > { %1831 = vmatmul.msk.bf16.vlgmr.msrb.gmra.mxu2 %vm319_vm1, %v1828_v27 }
  0xd1   : > { %v733_v28 = vpop.permute.xlu0 %732  ;;  %v682_v29 = vpop.permute.xlu1 %681 }
  0xd2   : > { %v739_v30 = vsel %vm323_vm0, %v733_v28, 0  ;;  %v734_v31 = vsel %vm638_vm4, %v731_v16, %v733_v28  ;;  %v685_v32 = vsel %vm638_vm4, %v682_v29, %v684_v20 }
  0xd3   : > { %v736_v33 = vsel %vm323_vm0, %v734_v31, 0  ;;  %v690_v34 = vsel %vm323_vm0, %v685_v32, 0  ;;  %761 = vmatpush.bf16.msra.mxu3 %v739_v30 }
  0xd4   : > { %748 = vmatpush.bf16.msra.mxu2 %v736_v33  ;;  %702 = vmatpush.bf16.msra.mxu0 %v690_v34 }
  0xda   : > { %v927_v37 = vpop.permute.xlu2 %926 }
  0xdb   : > { %v934_v40 = vsel %vm323_vm0, %v927_v37, 0 }
  0xde   : > { %1835 = vmatmul.msk.bf16.vlgmr.msra.gmra.mxu1 %vm319_vm1, %v1833_v36  ;;  %1837 = vmatmul.msk.bf16.vlgmr.msra.gmra.mxu3 %vm319_vm1, %v1833_v36 }
  0xdf   : > { %1834 = vmatmul.msk.bf16.vlgmr.msra.gmra.mxu0 %vm319_vm1, %v1833_v36 }
  0xe0   : > { %1836 = vmatmul.msk.bf16.vlgmr.msra.gmra.mxu2 %vm319_vm1, %v1833_v36 }
  0xe1   : > { %v828_v38 = vpop.permute.xlu1 %827  ;;  %v826_v39 = vpop.permute.xlu0 %825 }
  0xe2   : > { %v835_v41 = vsel %vm323_vm0, %v828_v38, 0  ;;  %v830_v42 = vsel %vm829_vm6, %v826_v39, %v828_v38 }
  0xe3   : > { %v832_v43 = vsel %vm323_vm0, %v830_v42, 0  ;;  %857 = vmatpush.bf16.msrb.mxu3 %v835_v41 }
  0xe4   : > { %844 = vmatpush.bf16.msrb.mxu2 %v832_v43 }
  0xe7   : > { %956 = vmatpush.bf16.msra.mxu3 %v934_v40 }
  0xe9   : > { %v779_v44 = vpop.permute.xlu0 %778 }
  0xea   : > { %v780_v45 = vsel %vm638_vm4, %v777_v35, %v779_v44  ;;  %v788_v46 = vsel %vm323_vm0, %v779_v44, 0  ;;  %v1021_v49 = vpop.permute.xlu2 %1020 }
  0xeb   : > { %v785_v47 = vsel %vm323_vm0, %v780_v45, 0  ;;  %810 = vmatpush.bf16.msrb.mxu1 %v788_v46 }
  0xec   : > { %797 = vmatpush.bf16.msrb.mxu0 %v785_v47 }
  0xee   : > { %1840 = vmatmul.msk.bf16.vlgmr.msrb.gmra.mxu1 %vm319_vm1, %v1838_v48  ;;  %1842 = vmatmul.msk.bf16.vlgmr.msrb.gmra.mxu3 %vm319_vm1, %v1838_v48 }
  0xef   : > { %1839 = vmatmul.msk.bf16.vlgmr.msrb.gmra.mxu0 %vm319_vm1, %v1838_v48 }
  0xf0   : > { %1841 = vmatmul.msk.bf16.vlgmr.msrb.gmra.mxu2 %vm319_vm1, %v1838_v48 }
  0xf1   : > { %v925_v50 = vpop.permute.xlu1 %924  ;;  %v875_v54 = vpop.permute.xlu0 %874 }
  0xf2   : > { %v929_v51 = vsel %vm928_vm7, %v925_v50, %v927_v37  ;;  %v974_v53 = vpop.permute.xlu2 %973 }
  0xf3   : > { %v931_v52 = vsel %vm323_vm0, %v929_v51, 0  ;;  %v983_v56 = vsel %vm323_vm0, %v974_v53, 0 }
  0xf4   : > { %943 = vmatpush.bf16.msra.mxu2 %v931_v52 }
  0xf9   : > { %v877_v55 = vpop.permute.xlu1 %876 }
  0xfa   : > { %v879_v57 = vsel %vm878_vm8, %v875_v54, %v877_v55  ;;  %v887_v58 = vsel %vm323_vm0, %v877_v55, 0  ;;  %v1067_v20 = vpop.permute.xlu2 %1066 }
  0xfb   : > { %v884_v59 = vsel %vm323_vm0, %v879_v57, 0  ;;  %909 = vmatpush.bf16.msra.mxu1 %v887_v58 }
  0xfc   : > { %896 = vmatpush.bf16.msra.mxu0 %v884_v59 }
  0xfe   : > { %1845 = vmatmul.msk.bf16.vlgmr.msra.gmra.mxu1 %vm319_vm1, %v1843_v60  ;;  %1847 = vmatmul.msk.bf16.vlgmr.msra.gmra.mxu3 %vm319_vm1, %v1843_v60 }
  0xff   : > { %1005 = vmatpush.bf16.msrb.mxu1 %v983_v56  ;;  %1844 = vmatmul.msk.bf16.vlgmr.msra.gmra.mxu0 %vm319_vm1, %v1843_v60 }
 0x100   : > { %1846 = vmatmul.msk.bf16.vlgmr.msra.gmra.mxu2 %vm319_vm1, %v1843_v60 }
 0x101   : > { %v1023_v0 = vpop.permute.xlu0 %1022  ;;  %v972_v1 = vpop.permute.xlu1 %971 }
 0x102   : > { %v1029_v2 = vsel %vm323_vm0, %v1023_v0, 0  ;;  %v1024_v3 = vsel %vm928_vm7, %v1021_v49, %v1023_v0  ;;  %v975_v4 = vsel %vm928_vm7, %v972_v1, %v974_v53 }
 0x103   : > { %v1026_v5 = vsel %vm323_vm0, %v1024_v3, 0  ;;  %v980_v6 = vsel %vm323_vm0, %v975_v4, 0  ;;  %1051 = vmatpush.bf16.msrb.mxu3 %v1029_v2 }
 0x104   : > { %1038 = vmatpush.bf16.msrb.mxu2 %v1026_v5  ;;  %992 = vmatpush.bf16.msrb.mxu0 %v980_v6 }
 0x10e   : > { %1850 = vmatmul.msk.bf16.vlgmr.msrb.gmra.mxu1 %vm319_vm1, %v1848_v10  ;;  %1852 = vmatmul.msk.bf16.vlgmr.msrb.gmra.mxu3 %vm319_vm1, %v1848_v10 }
 0x10f   : > { %1849 = vmatmul.msk.bf16.vlgmr.msrb.gmra.mxu0 %vm319_vm1, %v1848_v10 }
 0x110   : > { %1851 = vmatmul.msk.bf16.vlgmr.msrb.gmra.mxu2 %vm319_vm1, %v1848_v10 }
 0x111   : > { %v1118_v11 = vpop.permute.xlu1 %1117  ;;  %v1116_v12 = vpop.permute.xlu0 %1115 }
 0x112   : > { %v1125_v13 = vsel %vm323_vm0, %v1118_v11, 0  ;;  %v1120_v14 = vsel %vm1119_vm9, %v1116_v12, %v1118_v11 }
 0x113   : > { %v1122_v15 = vsel %vm323_vm0, %v1120_v14, 0  ;;  %v352_v16 = vpop.f32.mrf.mxu1  ;;  %1147 = vmatpush.bf16.msra.mxu3 %v1125_v13 }
 0x114   : > { %1134 = vmatpush.bf16.msra.mxu2 %v1122_v15  ;;  %v339_v17 = vpop.f32.mrf.mxu0  ;;  %v390_v18 = vadd.f32 %v389_v61, %v352_v16 }
 0x115   : > { %v377_v19 = vadd.f32 %v376_v62, %v339_v17 }
 0x119   : > { %v1069_v21 = vpop.permute.xlu0 %1068 }
 0x11a   : > { %v1070_v22 = vsel %vm928_vm7, %v1067_v20, %v1069_v21  ;;  %v1078_v23 = vsel %vm323_vm0, %v1069_v21, 0 }
 0x11b   : > { %v1075_v24 = vsel %vm323_vm0, %v1070_v22, 0  ;;  %1100 = vmatpush.bf16.msra.mxu1 %v1078_v23  ;;  %v354_v26 = vpop.f32.mrf.mxu1 }
 0x11c   : > { %1087 = vmatpush.bf16.msra.mxu0 %v1075_v24  ;;  %v341_v27 = vpop.f32.mrf.mxu0 }
 0x11e   : > { %1855 = vmatmul.msk.bf16.vlgmr.msra.gmra.mxu1 %vm319_vm1, %v1853_v25  ;;  %1857 = vmatmul.msk.bf16.vlgmr.msra.gmra.mxu3 %vm319_vm1, %v1853_v25 }
 0x11f   : > { %1854 = vmatmul.msk.bf16.vlgmr.msra.gmra.mxu0 %vm319_vm1, %v1853_v25 }
 0x120   : > { %1856 = vmatmul.msk.bf16.vlgmr.msra.gmra.mxu2 %vm319_vm1, %v1853_v25 }
 0x123   : > { %v433_v28 = vpop.f32.mrf.mxu1 }
 0x124   : > { %v420_v29 = vpop.f32.mrf.mxu0 }
 0x12b   : > { %v435_v30 = vpop.f32.mrf.mxu1 }
 0x12c   : > { %v422_v31 = vpop.f32.mrf.mxu0 }
 0x131   : > { %v475_v32 = vpop.f32.mrf.mxu3 }
 0x132   : > { %v476_v33 = vadd.f32 %v475_v32, %v433_v28  ;;  %v462_v34 = vpop.f32.mrf.mxu2 }
 0x133   : > { %v463_v35 = vadd.f32 %v462_v34, %v420_v29 }
 0x139   : > { %v477_v36 = vpop.f32.mrf.mxu3 }
 0x13a   : > { %v464_v37 = vpop.f32.mrf.mxu2 }
 0x13b   : > { %v522_v38 = vpop.f32.mrf.mxu1 }
 0x13c   : > { %v527_v39 = vadd.f32 %v522_v38, %v390_v18  ;;  %v509_v40 = vpop.f32.mrf.mxu0 }
 0x13d   : > { %v526_v41 = vadd.f32 %v509_v40, %v377_v19 }
 0x141   : > { %v569_v42 = vpop.f32.mrf.mxu3 }
 0x142   : > { %v574_v43 = vadd.f32 %v569_v42, %v476_v33  ;;  %v556_v44 = vpop.f32.mrf.mxu2  ;;  %v1165_v42 = vld [vmem:[%s2302_s6] ss:$2 sm:$0x3] }
 0x143   : > { %v573_v45 = vadd.f32 %v556_v44, %v463_v35  ;;  %v524_v46 = vpop.f32.mrf.mxu1 }
 0x144   : > { %v511_v47 = vpop.f32.mrf.mxu0 }
 0x149   : > { %v571_v48 = vpop.f32.mrf.mxu3 }
 0x14a   : > { %v558_v49 = vpop.f32.mrf.mxu2 }
 0x14b   : > { %v621_v50 = vpop.f32.mrf.mxu1 }
 0x14c   : > { %v626_v51 = vadd.f32 %v621_v50, %v527_v39  ;;  %v608_v52 = vpop.f32.mrf.mxu0  ;;  %v1168_v50 = vperm.slane %v1165_v42, 1 }
 0x14d   : > { %v625_v53 = vadd.f32 %v608_v52, %v526_v41  ;;  %v1159_v41 = vpop.permute.xlu1 %1158 }
 0x151   : > { %v668_v54 = vpop.f32.mrf.mxu3 }
 0x152   : > { %v673_v55 = vadd.f32 %v668_v54, %v574_v43 }
 0x153   : > { %v655_v56 = vpop.f32.mrf.mxu2  ;;  %v623_v58 = vpop.f32.mrf.mxu1 }
 0x154   : > { %v672_v57 = vadd.f32 %v655_v56, %v573_v45  ;;  %v610_v59 = vpop.f32.mrf.mxu0 }
 0x155   : > { %v1858_v59 = vld [vmem:[%s2302_s6 + $0x1] ss:$2 sm:$0x3] }
 0x159   : > { %v670_v60 = vpop.f32.mrf.mxu3 }
 0x15b   : > { %v657_v61 = vpop.f32.mrf.mxu2  ;;  %v717_v62 = vpop.f32.mrf.mxu1 }
 0x15c   : > { %v704_v63 = vpop.f32.mrf.mxu0  ;;  %v722_v27 = vadd.f32 %v717_v62, %v626_v51 }
 0x15d   : > { %v721_v29 = vadd.f32 %v704_v63, %v625_v53  ;;  %v1167_v53 = vperm.slane %v1165_v42, 0 }
 0x161   : > { %v763_v0 = vpop.f32.mrf.mxu3 }
 0x162   : > { %v768_v35 = vadd.f32 %v763_v0, %v673_v55 }
 0x163   : > { %v750_v1 = vpop.f32.mrf.mxu2  ;;  %v719_v2 = vpop.f32.mrf.mxu1 }
 0x164   : > { %v706_v3 = vpop.f32.mrf.mxu0  ;;  %v767_v38 = vadd.f32 %v750_v1, %v672_v57 }
 0x165   : > { %v1181_v3 = vperm.slane %v1858_v59, 1 }
 0x169   : > { %v765_v4 = vpop.f32.mrf.mxu3 }
 0x16b   : > { %v752_v5 = vpop.f32.mrf.mxu2  ;;  %v812_v6 = vpop.f32.mrf.mxu1 }
 0x16c   : > { %v799_v7 = vpop.f32.mrf.mxu0  ;;  %v817_v30 = vadd.f32 %v812_v6, %v722_v27  ;;  %v1180_v6 = vperm.slane %v1858_v59, 0 }
 0x16d   : > { %v816_v31 = vadd.f32 %v799_v7, %v721_v29 }
 0x171   : > { %v859_v8 = vpop.f32.mrf.mxu3 }
 0x172   : > { %v864_v43 = vadd.f32 %v859_v8, %v768_v35 }
 0x173   : > { %v846_v9 = vpop.f32.mrf.mxu2  ;;  %v814_v10 = vpop.f32.mrf.mxu1 }
 0x174   : > { %v801_v11 = vpop.f32.mrf.mxu0  ;;  %v863_v46 = vadd.f32 %v846_v9, %v767_v38 }
 0x179   : > { %v861_v12 = vpop.f32.mrf.mxu3 }
 0x17b   : > { %v848_v13 = vpop.f32.mrf.mxu2  ;;  %v911_v14 = vpop.f32.mrf.mxu1 }
 0x17c   : > { %v898_v15 = vpop.f32.mrf.mxu0  ;;  %v916_v32 = vadd.f32 %v911_v14, %v817_v30 }
 0x17d   : > { %v915_v33 = vadd.f32 %v898_v15, %v816_v31 }
 0x181   : > { %v958_v16 = vpop.f32.mrf.mxu3 }
 0x182   : > { %v963_v48 = vadd.f32 %v958_v16, %v864_v43 }
 0x183   : > { %v945_v17 = vpop.f32.mrf.mxu2  ;;  %v913_v18 = vpop.f32.mrf.mxu1 }
 0x184   : > { %v900_v19 = vpop.f32.mrf.mxu0  ;;  %v962_v51 = vadd.f32 %v945_v17, %v863_v46 }
 0x189   : > { %v960_v20 = vpop.f32.mrf.mxu3 }
 0x18b   : > { %v947_v21 = vpop.f32.mrf.mxu2  ;;  %v1007_v22 = vpop.f32.mrf.mxu1 }
 0x18c   : > { %v994_v23 = vpop.f32.mrf.mxu0  ;;  %v1012_v36 = vadd.f32 %v1007_v22, %v916_v32 }
 0x18d   : > { %v1011_v39 = vadd.f32 %v994_v23, %v915_v33 }
 0x191   : > { %v1053_v24 = vpop.f32.mrf.mxu3 }
 0x192   : > { %v1058_v54 = vadd.f32 %v1053_v24, %v963_v48 }
 0x193   : > { %v1040_v25 = vpop.f32.mrf.mxu2  ;;  %v1009_v26 = vpop.f32.mrf.mxu1 }
 0x194   : > { %v996_v28 = vpop.f32.mrf.mxu0  ;;  %v1057_v56 = vadd.f32 %v1040_v25, %v962_v51 }
 0x199   : > { %v1055_v34 = vpop.f32.mrf.mxu3 }
 0x19b   : > { %v1042_v37 = vpop.f32.mrf.mxu2  ;;  %v1102_v40 = vpop.f32.mrf.mxu1 }
 0x19c   : > { %v1107_v44 = vadd.f32 %v1102_v40, %v1012_v36  ;;  %v1089_v45 = vpop.f32.mrf.mxu0 }
 0x19d   : > { %v1106_v47 = vadd.f32 %v1089_v45, %v1011_v39 }
 0x19e   : > { %v1162_v49 = vadd.f32 %v1159_v41, %v1107_v44 }
 0x19f   : > { %v1161_v52 = vadd.f32 %v1159_v41, %v1106_v47 }
 0x1a0   : > { %v1164_v55 = vmax.f32 %v1162_v49, 0.0 }
 0x1a1   : > { %v1163_v57 = vmax.f32 %v1161_v52, 0.0  ;;  %v1149_v58 = vpop.f32.mrf.mxu3 }
 0x1a2   : > { %v1154_v60 = vadd.f32 %v1149_v58, %v1058_v54  ;;  %v1172_v62 = vmul.f32 %v1168_v50, %v1164_v55  ;;  %v2193_v54 = vld [vmem:[%s1999_s9] sm:$0xf] }
 0x1a3   : > { %v1136_v61 = vpop.f32.mrf.mxu2  ;;  %v1104_v0 = vpop.f32.mrf.mxu1  ;;  %v1171_v1 = vmul.f32 %v1167_v53, %v1163_v57  ;;  %v1653_v55 = vunpack.c.l.bf16 %v2193_v54  ;;  %v2202_v58 = vld [vmem:[%s1992_s29] sm:$0xf] }
 0x1a4   : > { %v1153_v63 = vadd.f32 %v1136_v61, %v1057_v56  ;;  %v1174_v2 = vadd.f32 %v1159_v41, %v1154_v60  ;;  %v1091_v4 = vpop.f32.mrf.mxu0  ;;  %v1670_v59 = vunpack.c.l.bf16 %v2202_v58  ;;  %v1859_v60 = vld [vmem:[%s2299_s3 + $0x2] sm:$0x3]  ;;  %v1864_v0 = vld [vmem:[%s2299_s3 + $0x4] sm:$0x3] }
 0x1a5   : > { %v1186_v7 = vpack.c.bf16 %v1172_v62, %v1171_v1 }
 0x1a6   : > { %v1173_v5 = vadd.f32 %v1159_v41, %v1153_v63  ;;  %v1176_v8 = vmax.f32 %v1174_v2, 0.0  ;;  %v1216_v63 = vld [vmem:[%s2299_s3] sm:$0x3] }
 0x1a7   : > { %v1188_v10 = vrot.slane %v1186_v7, 2 }
 0x1a8   : > { %v1175_v9 = vmax.f32 %v1173_v5, 0.0  ;;  %v1185_v11 = vmul.f32 %v1181_v3, %v1176_v8 }
 0x1a9   : > { %v1191_v13 = vsel %vm323_vm0, %v1186_v7, %v1188_v10  ;;  %v1151_v14 = vpop.f32.mrf.mxu3 }
 0x1aa   : > { %v1184_v12 = vmul.f32 %v1180_v6, %v1175_v9  ;;  %1193 = vrot.lane.b32.xlu0 %v1191_v13, %s1937_s8 }
 0x1ab   : > { %v1138_v15 = vpop.f32.mrf.mxu2 }
 0x1ac   : > { %v1203_v16 = vpack.c.bf16 %v1185_v11, %v1184_v12  ;;  %v1867_v12 = vld [vmem:[%s2299_s3 + $0x6] sm:$0x3] }
 0x1ae   : > { %v1205_v17 = vrot.slane %v1203_v16, 2 }
 0x1b0   : > { %v1208_v18 = vsel %vm323_vm0, %v1203_v16, %v1205_v17  ;;  %v1870_v17 = vld [vmem:[%s2299_s3 + $0x8] sm:$0x3] }
 0x1b1   : > { %1210 = vrot.lane.b32.xlu2 %v1208_v18, %s1937_s8 }
 0x20b   : > { %v1211_v19 = vpop.permute.xlu2 %1210 }
 0x20c   : > { %v1212_v20 = vrot.slane %v1211_v19, 6 }
 0x20e   : > { %v1213_v21 = vsel %vm1196_vm12, %v1212_v20, %v1211_v19 }
 0x20f   : > { %1215 = vst.msk [vmem:[#allocation3] sm:$0xf] %vm1201_vm13, %v1213_v21 }
 0x216   : > { %v1220_v22 = vld [vmem:[#allocation3] sm:$0xf] }
 0x217   : > { %1222 = vst [vmem:[#allocation1] ss:$4 sm:$0xff] %v1220_v22  ;;  %v1399_v39 = vld [vmem:[#allocation3] sm:$0xf] }
 0x218   : > { %v1552_v48 = vld [vmem:[#allocation3] sm:$0xf] }
 0x21c   : > { %v1194_v23 = vpop.permute.xlu0 %1193 }
 0x21d   : > { %v1195_v24 = vrot.slane %v1194_v23, 6 }
 0x21e   : > { %v1223_v25 = vld.sshfl [vmem:[#allocation1] sm:$0xff pattern:$0x73625140]  ;;  %v1224_v27 = vld.sshfl [vmem:[#allocation1 + $0x8] sm:$0xff pattern:$0x73625140] }
 0x21f   : > { %v1228_v26 = vsel %vm323_vm0, %v1223_v25, 0  ;;  %v1197_v28 = vsel %vm1196_vm12, %v1195_v24, %v1194_v23  ;;  %v1230_v29 = vsel %vm323_vm0, %v1224_v27, 0 }
 0x220   : > { %1239 = vmatpush.bf16.msrb.mxu0 %v1228_v26  ;;  %1202 = vst.msk [vmem:[#allocation2] sm:$0xf] %vm1201_vm13, %v1197_v28  ;;  %1252 = vmatpush.bf16.msrb.mxu1 %v1230_v29 }
 0x223   : > { %1861 = vmatmul.msk.bf16.vlgmr.msrb.gmra.mxu1 %vm319_vm1, %v1859_v60  ;;  %1860 = vmatmul.msk.bf16.vlgmr.msrb.gmra.mxu0 %vm319_vm1, %v1859_v60 }
 0x227   : > { %v1217_v30 = vld [vmem:[#allocation2] sm:$0xf] }
 0x228   : > { %1259 = vst [vmem:[#allocation1] ss:$4 sm:$0xff] %v1217_v30  ;;  %v1297_v31 = vld [vmem:[#allocation2] sm:$0xf] }
 0x229   : > { %v1348_v36 = vld [vmem:[#allocation2] sm:$0xf] }
 0x22a   : > { %v1450_v42 = vld [vmem:[#allocation2] sm:$0xf] }
 0x22b   : > { %v1501_v45 = vld [vmem:[#allocation2] sm:$0xf] }
 0x22c   : > { %v1603_v51 = vld [vmem:[#allocation2] sm:$0xf] }
 0x22f   : > { %v1260_v32 = vld.sshfl [vmem:[#allocation1] sm:$0xff pattern:$0x73625140]  ;;  %v1261_v33 = vld.sshfl [vmem:[#allocation1 + $0x8] sm:$0xff pattern:$0x73625140] }
 0x230   : > { %v1265_v34 = vsel %vm323_vm0, %v1260_v32, 0  ;;  %v1267_v35 = vsel %vm323_vm0, %v1261_v33, 0  ;;  %1299 = vst [vmem:[#allocation1] ss:$4 sm:$0xff] %v1297_v31  ;;  %v1873_v33 = vld [vmem:[%s2299_s3 + $0xa] sm:$0x3] }
 0x231   : > { %1276 = vmatpush.bf16.msrb.mxu2 %v1265_v34  ;;  %1289 = vmatpush.bf16.msrb.mxu3 %v1267_v35  ;;  %v1876_v34 = vld [vmem:[%s2299_s3 + $0xc] sm:$0x3]  ;;  %v1702_v35 = vld [vmem:[%s2301_s5] sm:$0xf] }
 0x234   : > { %1863 = vmatmul.msk.bf16.vlgmr.msrb.gmra.mxu3 %vm319_vm1, %v1216_v63  ;;  %1862 = vmatmul.msk.bf16.vlgmr.msrb.gmra.mxu2 %vm319_vm1, %v1216_v63 }
 0x237   : > { %v1302_v37 = vld.sshfl [vmem:[#allocation1 + $0x8] sm:$0xff pattern:$0x73625140]  ;;  %v1300_v38 = vld.sshfl [vmem:[#allocation1] sm:$0xff pattern:$0x73625140] }
 0x238   : > { %1306 = vrot.lane.b32.xlu2 %v1302_v37, %s1928_s10  ;;  %1304 = vrot.lane.b32.xlu1 %v1300_v38, %s1928_s10  ;;  %1350 = vst [vmem:[#allocation1] ss:$4 sm:$0xff] %v1348_v36 }
 0x23f   : > { %v1353_v40 = vld.sshfl [vmem:[#allocation1 + $0x8] sm:$0xff pattern:$0x73625140]  ;;  %v1351_v41 = vld.sshfl [vmem:[#allocation1] sm:$0xff pattern:$0x73625140] }
 0x240   : > { %1357 = vrot.lane.b32.xlu1 %v1353_v40, %s1931_s13  ;;  %1355 = vrot.lane.b32.xlu0 %v1351_v41, %s1931_s13  ;;  %1401 = vst [vmem:[#allocation1] ss:$4 sm:$0xff] %v1399_v39 }
 0x247   : > { %v1404_v43 = vld.sshfl [vmem:[#allocation1 + $0x8] sm:$0xff pattern:$0x73625140]  ;;  %v1402_v44 = vld.sshfl [vmem:[#allocation1] sm:$0xff pattern:$0x73625140] }
 0x248   : > { %1408 = vrot.lane.b32.xlu0 %v1404_v43, %s1931_s13  ;;  %1406 = vrot.lane.b32.xlu2 %v1402_v44, %s1931_s13  ;;  %1452 = vst [vmem:[#allocation1] ss:$4 sm:$0xff] %v1450_v42 }
 0x24f   : > { %v1455_v46 = vld.sshfl [vmem:[#allocation1 + $0x8] sm:$0xff pattern:$0x73625140]  ;;  %v1453_v47 = vld.sshfl [vmem:[#allocation1] sm:$0xff pattern:$0x73625140] }
 0x250   : > { %1459 = vrot.lane.b32.xlu2 %v1455_v46, %s1930_s12  ;;  %1457 = vrot.lane.b32.xlu1 %v1453_v47, %s1930_s12  ;;  %1503 = vst [vmem:[#allocation1] ss:$4 sm:$0xff] %v1501_v45  ;;  %v1879_v45 = vld [vmem:[%s2299_s3 + $0xe] sm:$0x3]  ;;  %v1882_v47 = vld [vmem:[%s2299_s3 + $0x10] sm:$0x3] }
 0x257   : > { %v1506_v49 = vld.sshfl [vmem:[#allocation1 + $0x8] sm:$0xff pattern:$0x73625140]  ;;  %v1504_v50 = vld.sshfl [vmem:[#allocation1] sm:$0xff pattern:$0x73625140] }
 0x258   : > { %1510 = vrot.lane.b32.xlu1 %v1506_v49, %s1934_s18  ;;  %1508 = vrot.lane.b32.xlu0 %v1504_v50, %s1934_s18  ;;  %1554 = vst [vmem:[#allocation1] ss:$4 sm:$0xff] %v1552_v48 }
 0x25f   : > { %v1557_v52 = vld.sshfl [vmem:[#allocation1 + $0x8] sm:$0xff pattern:$0x73625140]  ;;  %v1555_v53 = vld.sshfl [vmem:[#allocation1] sm:$0xff pattern:$0x73625140] }
 0x260   : > { %1561 = vrot.lane.b32.xlu0 %v1557_v52, %s1934_s18  ;;  %1559 = vrot.lane.b32.xlu2 %v1555_v53, %s1934_s18  ;;  %1605 = vst [vmem:[#allocation1] ss:$4 sm:$0xff] %v1603_v51  ;;  %s298_s18 = scalar_lea.vmem %s2303_s7, %s1986_s26 }
 0x267   : > { %v1608_v56 = vld.sshfl [vmem:[#allocation1 + $0x8] sm:$0xff pattern:$0x73625140]  ;;  %v1606_v57 = vld.sshfl [vmem:[#allocation1] sm:$0xff pattern:$0x73625140] }
 0x268   : > { %1655 = vrot.lane.b32.xlu0 %v1653_v55, %s1931_s13  ;;  %1612 = vrot.lane.b32.xlu2 %v1608_v56, %s1933_s17 }
 0x269   : > { %1610 = vrot.lane.b32.xlu1 %v1606_v57, %s1933_s17 }
 0x270   : > { %1705 = vperm.xlu0 %1914, %v1702_v35  }
 0x271   : > { %1672 = vrot.lane.b32.xlu1 %v1670_v59, %s1931_s13 }
 0x292   : > { %v1307_v61 = vpop.permute.xlu2 %1306 }
 0x293   : > { %v1316_v62 = vsel %vm323_vm0, %v1307_v61, 0 }
 0x294   : > { %1338 = vmatpush.bf16.msra.mxu1 %v1316_v62 }
 0x297   : > { %1866 = vmatmul.msk.bf16.vlgmr.msra.gmra.mxu1 %vm319_vm1, %v1864_v0 }
 0x2a0   : > { %v1241_v54 = vpop.f32.mrf.mxu0 }
 0x2a2   : > { %v1407_v1 = vpop.permute.xlu2 %1406 }
 0x2a8   : > { %v1243_v60 = vpop.f32.mrf.mxu0 }
 0x2aa   : > { %v1305_v2 = vpop.permute.xlu1 %1304  ;;  %v1460_v5 = vpop.permute.xlu2 %1459 }
 0x2ab   : > { %v1308_v3 = vsel %vm317_vm2, %v1305_v2, %v1307_v61  ;;  %v1469_v10 = vsel %vm323_vm0, %v1460_v5, 0 }
 0x2ac   : > { %v1313_v4 = vsel %vm323_vm0, %v1308_v3, 0 }
 0x2ad   : > { %1325 = vmatpush.bf16.msra.mxu0 %v1313_v4 }
 0x2b0   : > { %1865 = vmatmul.msk.bf16.vlgmr.msra.gmra.mxu0 %vm319_vm1, %v1864_v0 }
 0x2b2   : > { %v1358_v6 = vpop.permute.xlu1 %1357  ;;  %v1356_v7 = vpop.permute.xlu0 %1355 }
 0x2b3   : > { %v1367_v8 = vsel %vm323_vm0, %v1358_v6, 0  ;;  %v1359_v9 = vsel %vm588_vm5, %v1356_v7, %v1358_v6 }
 0x2b4   : > { %v1364_v11 = vsel %vm323_vm0, %v1359_v9, 0  ;;  %1389 = vmatpush.bf16.msra.mxu3 %v1367_v8 }
 0x2b5   : > { %1376 = vmatpush.bf16.msra.mxu2 %v1364_v11 }
 0x2b7   : > { %1869 = vmatmul.msk.bf16.vlgmr.msra.gmra.mxu3 %vm319_vm1, %v1867_v12  ;;  %v1278_v56 = vpop.f32.mrf.mxu2  ;;  %v1291_v57 = vpop.f32.mrf.mxu3 }
 0x2b8   : > { %1491 = vmatpush.bf16.msrb.mxu3 %v1469_v10  ;;  %1868 = vmatmul.msk.bf16.vlgmr.msra.gmra.mxu2 %vm319_vm1, %v1867_v12  ;;  %v1279_v58 = vadd.f32 %v1278_v56, %v1241_v54 }
 0x2ba   : > { %v1409_v13 = vpop.permute.xlu0 %1408  ;;  %v1560_v18 = vpop.permute.xlu2 %1559 }
 0x2bb   : > { %v1410_v14 = vsel %vm588_vm5, %v1407_v1, %v1409_v13  ;;  %v1418_v15 = vsel %vm323_vm0, %v1409_v13, 0 }
 0x2bc   : > { %v1415_v16 = vsel %vm323_vm0, %v1410_v14, 0  ;;  %1440 = vmatpush.bf16.msrb.mxu1 %v1418_v15 }
 0x2bd   : > { %1427 = vmatpush.bf16.msrb.mxu0 %v1415_v16 }
 0x2bf   : > { %1872 = vmatmul.msk.bf16.vlgmr.msrb.gmra.mxu1 %vm319_vm1, %v1870_v17  ;;  %v1280_v62 = vpop.f32.mrf.mxu2  ;;  %v1293_v63 = vpop.f32.mrf.mxu3 }
 0x2c0   : > { %1871 = vmatmul.msk.bf16.vlgmr.msrb.gmra.mxu0 %vm319_vm1, %v1870_v17 }
 0x2c2   : > { %v1458_v19 = vpop.permute.xlu1 %1457  ;;  %v1613_v22 = vpop.permute.xlu2 %1612 }
 0x2c3   : > { %v1461_v20 = vsel %vm638_vm4, %v1458_v19, %v1460_v5  ;;  %v1622_v27 = vsel %vm323_vm0, %v1613_v22, 0 }
 0x2c4   : > { %v1466_v21 = vsel %vm323_vm0, %v1461_v20, 0 }
 0x2c5   : > { %1478 = vmatpush.bf16.msrb.mxu2 %v1466_v21 }
 0x2c7   : > { %1875 = vmatmul.msk.bf16.vlgmr.msrb.gmra.mxu3 %vm319_vm1, %v1873_v33 }
 0x2c8   : > { %1874 = vmatmul.msk.bf16.vlgmr.msrb.gmra.mxu2 %vm319_vm1, %v1873_v33 }
 0x2ca   : > { %v1511_v23 = vpop.permute.xlu1 %1510  ;;  %v1509_v24 = vpop.permute.xlu0 %1508 }
 0x2cb   : > { %v1520_v25 = vsel %vm323_vm0, %v1511_v23, 0  ;;  %v1512_v26 = vsel %vm878_vm8, %v1509_v24, %v1511_v23 }
 0x2cc   : > { %v1517_v28 = vsel %vm323_vm0, %v1512_v26, 0  ;;  %1542 = vmatpush.bf16.msra.mxu1 %v1520_v25 }
 0x2cd   : > { %1529 = vmatpush.bf16.msra.mxu0 %v1517_v28 }
 0x2cf   : > { %1878 = vmatmul.msk.bf16.vlgmr.msra.gmra.mxu1 %vm319_vm1, %v1876_v34 }
 0x2d0   : > { %1644 = vmatpush.bf16.msrb.mxu1 %v1622_v27  ;;  %1877 = vmatmul.msk.bf16.vlgmr.msra.gmra.mxu0 %vm319_vm1, %v1876_v34 }
 0x2d2   : > { %v1562_v29 = vpop.permute.xlu0 %1561 }
 0x2d3   : > { %v1563_v30 = vsel %vm878_vm8, %v1560_v18, %v1562_v29  ;;  %v1571_v31 = vsel %vm323_vm0, %v1562_v29, 0 }
 0x2d4   : > { %v1568_v32 = vsel %vm323_vm0, %v1563_v30, 0  ;;  %1593 = vmatpush.bf16.msra.mxu3 %v1571_v31 }
 0x2d5   : > { %1580 = vmatpush.bf16.msra.mxu2 %v1568_v32 }
 0x2d7   : > { %1881 = vmatmul.msk.bf16.vlgmr.msra.gmra.mxu3 %vm319_vm1, %v1879_v45 }
 0x2d8   : > { %1880 = vmatmul.msk.bf16.vlgmr.msra.gmra.mxu2 %vm319_vm1, %v1879_v45 }
 0x2da   : > { %v1656_v36 = vpop.permute.xlu0 %1655 }
 0x2db   : > { %v1657_v37 = vrot.slane %v1656_v36, 4  ;;  %v1611_v38 = vpop.permute.xlu1 %1610 }
 0x2dc   : > { %v1614_v39 = vsel %vm928_vm7, %v1611_v38, %v1613_v22 }
 0x2dd   : > { %v1659_v40 = vsel %vm588_vm5, %v1656_v36, %v1657_v37  ;;  %v1619_v41 = vsel %vm323_vm0, %v1614_v39, 0 }
 0x2de   : > { %v1661_v42 = vmax.f32 %v1653_v55, %v1659_v40  ;;  %1631 = vmatpush.bf16.msrb.mxu0 %v1619_v41  ;;  %v1254_v55 = vpop.f32.mrf.mxu1 }
 0x2df   : > { %1884 = vmatmul.msk.bf16.vlgmr.msrb.gmra.mxu1 %vm319_vm1, %v1882_v47 }
 0x2e0   : > { %1663 = vst [vmem:[#allocation1] ss:$2 sm:$0xff] %v1661_v42 }
 0x2e1   : > { %1883 = vmatmul.msk.bf16.vlgmr.msrb.gmra.mxu0 %vm319_vm1, %v1882_v47 }
 0x2e3   : > { %v1673_v43 = vpop.permute.xlu1 %1672 }
 0x2e4   : > { %v1674_v44 = vrot.slane %v1673_v43, 4 }
 0x2e6   : > { %v1675_v46 = vsel %vm588_vm5, %v1673_v43, %v1674_v44  ;;  %v1256_v61 = vpop.f32.mrf.mxu1 }
 0x2e7   : > { %v1677_v48 = vmax.f32 %v1670_v59, %v1675_v46  ;;  %v1664_v49 = vld.sshfl [vmem:[#allocation1] sm:$0xff pattern:$0x75316420]  ;;  %v1665_v50 = vld.sshfl [vmem:[#allocation1 + $0x8] sm:$0xff pattern:$0x75316420]  ;;  %v1292_v59 = vadd.f32 %v1291_v57, %v1254_v55 }
 0x2e9   : > { %1679 = vst [vmem:[#allocation1] ss:$2 sm:$0xff] %v1677_v48 }
 0x2f0   : > { %v1680_v51 = vld.sshfl [vmem:[#allocation1] sm:$0xff pattern:$0x75316420]  ;;  %v1681_v52 = vld.sshfl [vmem:[#allocation1 + $0x8] sm:$0xff pattern:$0x75316420] }
 0x2f1   : > { %v1909_v53 = vpack.i.bf16 %v1681_v52, %v1680_v51 }
 0x2f3   : > { %1910 = vrot.lane.b32.xlu2 %v1909_v53, %s1928_s10 }
 0x314   : > { %v1340_v1 = vpop.f32.mrf.mxu1 }
 0x315   : > { %v1345_v3 = vadd.f32 %v1340_v1, %v1292_v59 }
 0x31c   : > { %v1342_v14 = vpop.f32.mrf.mxu1 }
 0x32d   : > { %v1327_v0 = vpop.f32.mrf.mxu0 }
 0x32e   : > { %v1344_v2 = vadd.f32 %v1327_v0, %v1279_v58 }
 0x335   : > { %v1329_v13 = vpop.f32.mrf.mxu0 }
 0x33a   : > { %v1391_v5 = vpop.f32.mrf.mxu3 }
 0x33b   : > { %v1378_v4 = vpop.f32.mrf.mxu2  ;;  %v1396_v7 = vadd.f32 %v1391_v5, %v1345_v3 }
 0x33c   : > { %v1395_v6 = vadd.f32 %v1378_v4, %v1344_v2  ;;  %v1442_v20 = vpop.f32.mrf.mxu1 }
 0x33d   : > { %v1429_v19 = vpop.f32.mrf.mxu0  ;;  %v1447_v22 = vadd.f32 %v1442_v20, %v1396_v7 }
 0x33e   : > { %v1446_v21 = vadd.f32 %v1429_v19, %v1395_v6 }
 0x342   : > { %v1393_v17 = vpop.f32.mrf.mxu3 }
 0x343   : > { %v1380_v16 = vpop.f32.mrf.mxu2 }
 0x344   : > { %v1444_v28 = vpop.f32.mrf.mxu1 }
 0x345   : > { %v1431_v27 = vpop.f32.mrf.mxu0 }
 0x34a   : > { %v1493_v24 = vpop.f32.mrf.mxu3 }
 0x34b   : > { %v1480_v23 = vpop.f32.mrf.mxu2  ;;  %v1498_v26 = vadd.f32 %v1493_v24, %v1447_v22 }
 0x34c   : > { %v1497_v25 = vadd.f32 %v1480_v23, %v1446_v21  ;;  %v1544_v32 = vpop.f32.mrf.mxu1 }
 0x34d   : > { %v1911_v8 = vpop.permute.xlu2 %1910  ;;  %v1531_v31 = vpop.f32.mrf.mxu0  ;;  %v1549_v34 = vadd.f32 %v1544_v32, %v1498_v26 }
 0x34e   : > { %v1913_v9 = vunpack.i.h.bf16 %v1911_v8  ;;  %v1912_v10 = vunpack.i.l.bf16 %v1911_v8  ;;  %v1548_v33 = vadd.f32 %v1531_v31, %v1497_v25 }
 0x350   : > { %v1700_v11 = vmax.f32 %v1665_v50, %v1913_v9  ;;  %v1696_v12 = vsel %vm317_vm2, %v1912_v10, %v1913_v9 }
 0x351   : > { %v1699_v15 = vmax.f32 %v1664_v49, %v1696_v12  ;;  %v1706_v49 = vpop.permute.xlu0 %1705 }
 0x352   : > { %v1495_v30 = vpop.f32.mrf.mxu3 }
 0x353   : > { %v1915_v18 = vpack.i.bf16 %v1700_v11, %v1699_v15  ;;  %v1482_v29 = vpop.f32.mrf.mxu2 }
 0x354   : > { %v1546_v40 = vpop.f32.mrf.mxu1 }
 0x355   : > { %1916 = vrot.lane.b32.xlu1 %v1915_v18, %s1930_s12  ;;  %v1533_v39 = vpop.f32.mrf.mxu0 }
 0x35a   : > { %v1595_v36 = vpop.f32.mrf.mxu3 }
 0x35b   : > { %v1582_v35 = vpop.f32.mrf.mxu2  ;;  %v1600_v38 = vadd.f32 %v1595_v36, %v1549_v34 }
 0x35c   : > { %v1599_v37 = vadd.f32 %v1582_v35, %v1548_v33  ;;  %v1646_v44 = vpop.f32.mrf.mxu1 }
 0x35d   : > { %v1651_v46 = vadd.f32 %v1646_v44, %v1600_v38 }
 0x35e   : > { %v1633_v43 = vpop.f32.mrf.mxu0 }
 0x35f   : > { %v1650_v45 = vadd.f32 %v1633_v43, %v1599_v37  ;;  %v1709_v51 = vadd.f32 %v1706_v49, %v1651_v46 }
 0x361   : > { %v1708_v54 = vadd.f32 %v1706_v49, %v1650_v45 }
 0x362   : > { %v1597_v42 = vpop.f32.mrf.mxu3 }
 0x363   : > { %v1584_v41 = vpop.f32.mrf.mxu2 }
 0x364   : > { %v1648_v48 = vpop.f32.mrf.mxu1 }
 0x366   : > { %v1635_v47 = vpop.f32.mrf.mxu0 }
 0x3c7   : > { %v1917_v50 = vpop.permute.xlu1 %1916 }
 0x3c8   : > { %v1919_v52 = vunpack.i.h.bf16 %v1917_v50  ;;  %v1918_v53 = vunpack.i.l.bf16 %v1917_v50 }
 0x3ca   : > { %v1723_v55 = vadd.f32 %v1919_v52, %v1709_v51  ;;  %v1719_v56 = vsel %vm638_vm4, %v1918_v53, %v1919_v52 }
 0x3cb   : > { %v1722_v57 = vadd.f32 %v1719_v56, %v1708_v54 }
 0x3cc   : > { %v1725_v58 = vmax.f32 %v1723_v55, 0.0 }
 0x3cd   : > { %v1724_v59 = vmax.f32 %v1722_v57, 0.0 }
 0x3cf   : > { %v1726_v60 = vpack.c.bf16 %v1725_v58, %v1724_v59 }
 0x3d1   : > { %v1728_v61 = vrot.slane %v1726_v60, 2 }
 0x3d3   : > { %v1731_v62 = vsel %vm323_vm0, %v1726_v60, %v1728_v61 }
 0x3d4   : > { %1735 = vst.msk [vmem:[%s298_s18] sm:$0xf] %vm1734_vm15, %v1731_v62 }
 0x3d5 PF: > { %s17_s24 = sadd.s32 1, %s1926_s24  }
 0x3d6   : > { %p14_p4 = scmp.ge.s32.totalorder %s17_s24, 4  }
 0x3d8   :  { %16 = sbr.rel (!%p14_p4) target bundleno = 1 (0x1), region = 98 }

</bundles_post_ra>
